<compile_context>
chip_gen: v7x
topology: tpu7x:2x2x1
jax: 0.10.0
libtpu: 0.0.40
codegen_flags: <defaults>
</compile_context>

<pallas_src>
from functools import partial

import jax
import jax.numpy as jnp
from jax.experimental import pallas as pl
from jax.experimental.pallas import tpu as pltpu

BN_EPS = 1e-5  # PyTorch BatchNorm2d default


def conv_stats_kernel(x_ref, w_ref, y_ref, stats_ref, *, ks, H_out, W_out):
    """One padded image -> lane-dense conv rows + per-channel partial BN statistics.

    x_ref:     (1, Hp, Wp, Cin)      zero-padded NHWC image tile
    w_ref:     (ks*ks*Cin, Cpad)     weight slab, Cout zero-padded to a lane multiple
    y_ref:     (H_out*W_out, Cpad)   conv output rows for this image (f32, lane-dense)
    stats_ref: (1, 2, Cpad)          [sum, sum-of-squares] over this image's pixels
    """
    Cin = x_ref.shape[-1]
    x = x_ref[0]  # (Hp, Wp, Cin)

    # Build the im2col slab for the whole tile ONCE; column order (dy, dx, ci)
    # matches the weight-slab repack in the wrapper.
    taps = [x[dy:dy + H_out, dx:dx + W_out, :]
            for dy in range(ks) for dx in range(ks)]
    patches = jnp.concatenate(taps, axis=-1).reshape(H_out * W_out, ks * ks * Cin)

    # Single MXU matmul per tile (K = ks*ks*Cin). Operands keep their native dtype;
    # f32 accumulation via preferred_element_type.
    acc = jnp.dot(patches, w_ref[...], preferred_element_type=jnp.float32)

    y_ref[...] = acc.astype(y_ref.dtype)

    # Partial BN statistics for this block (reduced across blocks in the wrapper).
    s1 = jnp.sum(acc, axis=0, keepdims=True)         # (1, Cpad)
    s2 = jnp.sum(acc * acc, axis=0, keepdims=True)   # (1, Cpad)
    stats_ref[...] = jnp.concatenate([s1, s2], axis=0)[None, :, :]


def bn_relu_kernel(y_ref, scale_ref, shift_ref, o_ref):
    """Element-wise normalize + affine + ReLU over a lane-dense (rows, Cpad) tile."""
    y = y_ref[...].astype(jnp.float32)
    out = jnp.maximum(y * scale_ref[...] + shift_ref[...], 0.0)
    o_ref[...] = out.astype(o_ref.dtype)


def _pick_row_tile(rows, cap=1024):
    """Largest multiple-of-8 divisor of `rows` <= min(cap, rows//2) so the phase-2
    grid has >=2 pipelined steps when possible; falls back to the full extent."""
    target = min(cap, max(rows // 2, 8))
    best = rows
    for t in range(8, target + 1, 8):
        if rows % t == 0:
            best = t
    return best


def conv_bn_relu(x_nchw, weight_oihw, gamma, beta, *, ks=3, stride=1, padding=1,
                 eps=BN_EPS):
    """Forward pass matching PyTorch ConvBNReLU (train-mode BN). NCHW in, NCHW out."""
    assert stride == 1, "TODO(synk): only stride=1 implemented (module default)"
    N, Cin, H, W = x_nchw.shape
    Cout = weight_oihw.shape[0]
    H_out = H + 2 * padding - ks + 1
    W_out = W + 2 * padding - ks + 1
    rows_per_img = H_out * W_out
    rows = N * rows_per_img
    Cpad = ((Cout + 127) // 128) * 128  # lane-dense channel dim (multiple of 128)

    # NCHW -> NHWC + spatial zero pad (Conv2d padding semantics).
    # TODO(synk): fetch the 1-px halo / zero-pad in-kernel from the unpadded NCHW
    # array to remove this extra HBM copy + relayout pass over the input.
    x = jnp.transpose(x_nchw, (0, 2, 3, 1))
    x = jnp.pad(x, ((0, 0), (padding, padding), (padding, padding), (0, 0)))
    Hp, Wp = H + 2 * padding, W + 2 * padding

    # (Cout, Cin, KH, KW) -> (KH, KW, Cin, Cout) -> (KH*KW*Cin, Cout) -> pad Cout->Cpad
    # so the matmul output, the BN/ReLU epilogue, and all stores are lane-dense
    # (unmasked vst instead of vst.msk — important on v5e's single store slot).
    w = jnp.transpose(weight_oihw, (2, 3, 1, 0)).reshape(ks * ks * Cin, Cout)
    w = jnp.pad(w, ((0, 0), (0, Cpad - Cout)))

    # ---- Phase 1: conv + per-block partial BN stats, tiled over the batch ---------
    # Per grid step VMEM: input tile + weight slab + (rows_per_img, Cpad) f32 output,
    # double-buffered by BlockSpec — far below the scoped VMEM default on v5e/v6e/v7x
    # at these shapes.  For large images add an H-block grid axis (halo'd loads) and
    # re-derive tile sizes against 64 MiB VMEM on v7x / raise vmem_limit_bytes on v6e.
    y_conv, stats = pl.pallas_call(
        partial(conv_stats_kernel, ks=ks, H_out=H_out, W_out=W_out),
        grid=(N,),
        in_specs=[
            pl.BlockSpec((1, Hp, Wp, Cin), lambda n: (n, 0, 0, 0)),
            pl.BlockSpec((ks * ks * Cin, Cpad), lambda n: (0, 0)),
        ],
        out_specs=(
            pl.BlockSpec((rows_per_img, Cpad), lambda n: (n, 0)),
            pl.BlockSpec((1, 2, Cpad), lambda n: (n, 0, 0)),
        ),
        out_shape=(
            jax.ShapeDtypeStruct((rows, Cpad), jnp.float32),
            jax.ShapeDtypeStruct((N, 2, Cpad), jnp.float32),
        ),
        compiler_params=pltpu.CompilerParams(
            dimension_semantics=("parallel",)),   # both TCs used on v7x megacore
    )(x, w)

    # ---- Tiny cross-block reduction + fold BN into per-channel scale/shift (XLA) --
    cnt = jnp.float32(rows)
    s1 = jnp.sum(stats[:, 0, :], axis=0)
    s2 = jnp.sum(stats[:, 1, :], axis=0)
    mean = s1 / cnt
    var = jnp.maximum(s2 / cnt - mean * mean, 0.0)  # biased (train-mode) variance, f32
    gamma_p = jnp.pad(gamma.astype(jnp.float32), (0, Cpad - Cout))
    beta_p = jnp.pad(beta.astype(jnp.float32), (0, Cpad - Cout))
    scale = gamma_p * jax.lax.rsqrt(var + eps)
    shift = beta_p - mean * scale

    # ---- Phase 2: element-wise normalize + affine + ReLU, row-tiled, lane-dense ---
    tr = _pick_row_tile(rows)
    out2 = pl.pallas_call(
        bn_relu_kernel,
        grid=(rows // tr,),
        in_specs=[
            pl.BlockSpec((tr, Cpad), lambda i: (i, 0)),
            pl.BlockSpec((1, Cpad), lambda i: (0, 0)),
            pl.BlockSpec((1, Cpad), lambda i: (0, 0)),
        ],
        out_specs=pl.BlockSpec((tr, Cpad), lambda i: (i, 0)),
        out_shape=jax.ShapeDtypeStruct((rows, Cpad), x_nchw.dtype),
        compiler_params=pltpu.CompilerParams(
            dimension_semantics=("parallel",)),
    )(y_conv, scale.reshape(1, Cpad), shift.reshape(1, Cpad))

    # Back to the PyTorch NCHW contract (drop padded channels).
    out_nhwc = out2.reshape(N, H_out, W_out, Cpad)[..., :Cout]
    return jnp.transpose(out_nhwc, (0, 3, 1, 2))


def reference(x_nchw, weight_oihw, gamma, beta, *, padding=1):
    """Pure-JAX reference (conv + train-mode BN + relu) for the correctness check."""
    y = jax.lax.conv_general_dilated(
        x_nchw.astype(jnp.float32), weight_oihw.astype(jnp.float32),
        window_strides=(1, 1), padding=[(padding, padding), (padding, padding)],
        dimension_numbers=("NCHW", "OIHW", "NCHW"))
    mean = jnp.mean(y, axis=(0, 2, 3), keepdims=True)
    var = jnp.mean(jnp.square(y - mean), axis=(0, 2, 3), keepdims=True)
    yn = (y - mean) * jax.lax.rsqrt(var + BN_EPS)
    yn = yn * gamma.reshape(1, -1, 1, 1) + beta.reshape(1, -1, 1, 1)
    return jnp.maximum(yn, 0.0)


if __name__ == "__main__":
    key = jax.random.PRNGKey(0)
    N, Cin, H, W = 2, 4, 16, 16
    Cout, ks = 8, 3

    kx, kw = jax.random.split(key)
    x = jax.random.normal(kx, (N, Cin, H, W), dtype=jnp.float32)

    # kaiming_normal_(a=1): gain = sqrt(2/(1+a^2)) = 1, fan_in = Cin*ks*ks
    fan_in = Cin * ks * ks
    weight = jax.random.normal(kw, (Cout, Cin, ks, ks), dtype=jnp.float32) * (1.0 / jnp.sqrt(fan_in))
    gamma = jnp.ones((Cout,), jnp.float32)   # BatchNorm2d default weight init
    beta = jnp.zeros((Cout,), jnp.float32)   # BatchNorm2d default bias init

    out = conv_bn_relu(x, weight, gamma, beta, ks=ks, stride=1, padding=1)
    out = jax.block_until_ready(out)

    ref = reference(x, weight, gamma, beta, padding=1)
    assert out.shape == (N, Cout, H, W)
    assert jnp.allclose(out, ref, rtol=1e-4, atol=1e-4)

    print("KERNEL_OK")
</pallas_src>

<mosaic_0001>
module attributes {stable_mosaic.version = 11 : i64} {
  func.func @conv_stats_kernel(%arg0: i32, %arg1: memref<1x18x18x4xf32, #tpu.memory_space<vmem>>, %arg2: memref<36x128xf32, #tpu.memory_space<vmem>>, %arg3: memref<256x128xf32, #tpu.memory_space<vmem>>, %arg4: memref<1x2x128xf32, #tpu.memory_space<vmem>>) attributes {dimension_semantics = [#tpu.dimension_semantics<parallel>], iteration_bounds = array<i64: 2>, scalar_prefetch = 0 : i64, scratch_operands = 0 : i64, tpu.core_type = #tpu.core_type<tc>, window_params = [{transform_indices = @transform_0, window_bounds = array<i64: 1, 18, 18, 4>}, {pipeline_mode = #tpu.pipeline_mode<synchronous>, transform_indices = @transform_1, window_bounds = array<i64: 36, 128>}, {transform_indices = @transform_2, window_bounds = array<i64: 256, 128>}, {transform_indices = @transform_3, window_bounds = array<i64: 1, 2, 128>}]} {
    %c0 = arith.constant 0 : index
    %c0_0 = arith.constant 0 : index
    %c0_1 = arith.constant 0 : index
    %c0_2 = arith.constant 0 : index
    %0 = vector.load %arg1[%c0, %c0_0, %c0_1, %c0_2] : memref<1x18x18x4xf32, #tpu.memory_space<vmem>>, vector<1x18x18x4xf32>
    %1 = vector.shape_cast %0 : vector<1x18x18x4xf32> to vector<18x18x4xf32>
    %2 = vector.extract_strided_slice %1 {offsets = [0, 0, 0], sizes = [16, 16, 4], strides = [1, 1, 1]} : vector<18x18x4xf32> to vector<16x16x4xf32>
    %3 = vector.extract_strided_slice %1 {offsets = [0, 1, 0], sizes = [16, 16, 4], strides = [1, 1, 1]} : vector<18x18x4xf32> to vector<16x16x4xf32>
    %4 = vector.extract_strided_slice %1 {offsets = [0, 2, 0], sizes = [16, 16, 4], strides = [1, 1, 1]} : vector<18x18x4xf32> to vector<16x16x4xf32>
    %5 = vector.extract_strided_slice %1 {offsets = [1, 0, 0], sizes = [16, 16, 4], strides = [1, 1, 1]} : vector<18x18x4xf32> to vector<16x16x4xf32>
    %6 = vector.extract_strided_slice %1 {offsets = [1, 1, 0], sizes = [16, 16, 4], strides = [1, 1, 1]} : vector<18x18x4xf32> to vector<16x16x4xf32>
    %7 = vector.extract_strided_slice %1 {offsets = [1, 2, 0], sizes = [16, 16, 4], strides = [1, 1, 1]} : vector<18x18x4xf32> to vector<16x16x4xf32>
    %8 = vector.extract_strided_slice %1 {offsets = [2, 0, 0], sizes = [16, 16, 4], strides = [1, 1, 1]} : vector<18x18x4xf32> to vector<16x16x4xf32>
    %9 = vector.extract_strided_slice %1 {offsets = [2, 1, 0], sizes = [16, 16, 4], strides = [1, 1, 1]} : vector<18x18x4xf32> to vector<16x16x4xf32>
    %10 = vector.extract_strided_slice %1 {offsets = [2, 2, 0], sizes = [16, 16, 4], strides = [1, 1, 1]} : vector<18x18x4xf32> to vector<16x16x4xf32>
    %11 = tpu.concatenate %2, %3, %4, %5, %6, %7, %8, %9, %10 in 2 : vector<16x16x4xf32>, vector<16x16x4xf32>, vector<16x16x4xf32>, vector<16x16x4xf32>, vector<16x16x4xf32>, vector<16x16x4xf32>, vector<16x16x4xf32>, vector<16x16x4xf32>, vector<16x16x4xf32> -> vector<16x16x36xf32>
    %12 = vector.shape_cast %11 : vector<16x16x36xf32> to vector<256x36xf32>
    %c0_3 = arith.constant 0 : index
    %c0_4 = arith.constant 0 : index
    %13 = vector.load %arg2[%c0_3, %c0_4] : memref<36x128xf32, #tpu.memory_space<vmem>>, vector<36x128xf32>
    %cst = arith.constant dense<0.000000e+00> : vector<256x128xf32>
    %14 = tpu.matmul %12, %13, %cst {dimension_numbers = #tpu.dot_dimension_numbers<[1], [0], [0], [1], [0, 0, 1, 1], [], []>} : vector<256x36xf32>, vector<36x128xf32>, vector<256x128xf32> -> vector<256x128xf32>
    %c0_5 = arith.constant 0 : index
    %c0_6 = arith.constant 0 : index
    %15 = vector.load %arg3[%c0_5, %c0_6] : memref<256x128xf32, #tpu.memory_space<vmem>>, vector<256x128xf32>
    tpu.vector_store %arg3[%c0_5, %c0_6], %14 {strides = array<i32>} : memref<256x128xf32, #tpu.memory_space<vmem>>, vector<256x128xf32>,
    %cst_7 = arith.constant dense<0.000000e+00> : vector<128xf32>
    %16 = vector.multi_reduction <add>, %14, %cst_7 [0] : vector<256x128xf32> to vector<128xf32>
    %17 = vector.shape_cast %16 : vector<128xf32> to vector<1x128xf32>
    %18 = arith.mulf %14, %14 : vector<256x128xf32>
    %cst_8 = arith.constant dense<0.000000e+00> : vector<128xf32>
    %19 = vector.multi_reduction <add>, %18, %cst_8 [0] : vector<256x128xf32> to vector<128xf32>
    %20 = vector.shape_cast %19 : vector<128xf32> to vector<1x128xf32>
    %21 = tpu.concatenate %17, %20 in 0 : vector<1x128xf32>, vector<1x128xf32> -> vector<2x128xf32>
    %22 = vector.shape_cast %21 : vector<2x128xf32> to vector<1x2x128xf32>
    %c0_9 = arith.constant 0 : index
    %c0_10 = arith.constant 0 : index
    %c0_11 = arith.constant 0 : index
    %23 = vector.load %arg4[%c0_9, %c0_10, %c0_11] : memref<1x2x128xf32, #tpu.memory_space<vmem>>, vector<1x2x128xf32>
    tpu.vector_store %arg4[%c0_9, %c0_10, %c0_11], %22 {strides = array<i32>} : memref<1x2x128xf32, #tpu.memory_space<vmem>>, vector<1x2x128xf32>,
    return
  }
  func.func @transform_0(%arg0: i32) -> (i32, i32, i32, i32) {
    %c0_i32 = arith.constant 0 : i32
    %c0_i32_0 = arith.constant 0 : i32
    %c0_i32_1 = arith.constant 0 : i32
    %c0_i32_2 = arith.constant 0 : i32
    return %arg0, %c0_i32, %c0_i32_0, %c0_i32_1 : i32, i32, i32, i32
  }
  func.func @transform_1(%arg0: i32) -> (i32, i32) {
    %c0_i32 = arith.constant 0 : i32
    %c0_i32_0 = arith.constant 0 : i32
    %c0_i32_1 = arith.constant 0 : i32
    return %c0_i32, %c0_i32_0 : i32, i32
  }
  func.func @transform_2(%arg0: i32) -> (i32, i32) {
    %c0_i32 = arith.constant 0 : i32
    %c0_i32_0 = arith.constant 0 : i32
    return %arg0, %c0_i32 : i32, i32
  }
  func.func @transform_3(%arg0: i32) -> (i32, i32, i32) {
    %c0_i32 = arith.constant 0 : i32
    %c0_i32_0 = arith.constant 0 : i32
    %c0_i32_1 = arith.constant 0 : i32
    return %arg0, %c0_i32, %c0_i32_0 : i32, i32, i32
  }
}

</mosaic_0001>

<bundles_post_ra>
// kernel: tpu_custom_call.1
= control target key start
LH: loop header
LB: loop body
LE: loop exit
PB: predicated region body
PF: predicated region fallthrough
CT: control target
= control target key end

     0   :  { %9 = vsyncpa [#allocation3], 0  ;;  %s4129_s0 = inlined_call_operand.vmem [shape: f32[2,18,18,4], index: 0, kind: input, shape index: {}]   ;;  %s4130_s1 = inlined_call_operand.vmem [shape: f32[36,128], index: 1, kind: input, shape index: {}]   ;;  %s4131_s2 = inlined_call_operand.hbm [shape: f32[512,128], index: 2, kind: output, shape index: {0}]   ;;  %s4132_s3 = inlined_call_operand.hbm [shape: f32[2,2,128], index: 3, kind: output, shape index: {1}]  }
   0x1   :  { %11 = vsyncpa [#allocation3 + $0x1], 0 }
   0x2   :  { %12 = vsyncpa [#allocation5], 0 }
   0x3   :  { %14 = vsyncpa [#allocation5 + $0x1], 0  ;;  %s2457_s12 = smov 0   ;;  %s2459_s13 = smov 0  }
   0x4   :  { %s2461_s14 = smov 0   ;;  %s2463_s15 = smov 0  }
   0x5 LB: > { %s2478_s16 = sadd.s32 4294967295, %s2424_s15   ;;  %s2101_s17 = sadd.s32 4294967294, %s2424_s15   ;;  %s2424_s15 = sphi %s2463_s15, %s4349_s15   ;;  %s2420_s14 = sphi %s2461_s14, %s4348_s14   ;;  %s2416_s13 = sphi %s2459_s13, %s4347_s13   ;;  %s2412_s12 = sphi %s2457_s12, %s4346_s12  }
   0x6   : > { %s2482_s18 = sadd.s32 1, %s2424_s15   ;;  %s74_s19 = sadd.s32 1, %s2420_s14 }
   0x7   : > { %s71_s20 = ssub.s32 %s2424_s15, %s2482_s18  ;;  %p84_p0 = scmp.ne.s32.totalorder %s2420_s14, %s2416_s13 }
   0x8   : > { %p72_p1 = scmp.eq.s32.totalorder %s71_s20, 0  ;;  %p85_p2 = scmp.eq.s32.totalorder %s2478_s16, 1 }
   0x9   : > { %p90_p3 = scmp.ne.s32.totalorder %s2416_s13, %s2412_s12  ;;  %p91_p4 = scmp.eq.s32.totalorder %s2101_s17, 1 }
   0xa   : > { %s2493_s21 = scalar_select %p72_p1, %s2420_s14, %s74_s19  }
   0xb   : > { %p2495_p5 = por %p85_p2, %p84_p0  ;;  %p2499_p6 = por %p91_p4, %p90_p3 }
   0xc   : > { %p2104_p7 = scmp.ge.s32.totalorder %s2424_s15, 1  ;;  %p146_p8 = scmp.lt.s32.totalorder %s2424_s15, 3 }
   0xe   : > { %p147_p9 = pnand %p2104_p7, %p146_p8 }
  0x10   : > { %150 = sbr.rel (%p147_p9) target bundleno = 917 (0x395), region = 28 }
  0x17   : > { %p175_p10 = scmp.lt.s32.totalorder %s2478_s16, 1  ;;  %vm283_vm0 = vcmask 1046528   ;;  %s2426_s29 = smov 4   ;;  %vm460_vm1 = vcmask 1045504   ;;  %vm1605_vm2 = vcmask 1043456   ;;  %vm1239_vm3 = vcmask 31744  }
  0x18   : > { %s2427_s30 = smov 8   ;;  %s2428_s4 = smov 12   ;;  %vm1272_vm4 = vcmask 64512   ;;  %vm1305_vm5 = vcmask 97280   ;;  %vm1338_vm6 = vcmask 130048   ;;  %vm1371_vm7 = vcmask 162816  }
  0x19   : > { %s176_s24 = scalar_select %p175_p10, %s2478_s16, 1  ;;  %vm1404_vm8 = vcmask 195584   ;;  %vm1437_vm9 = vcmask 228352   ;;  %vm1470_vm10 = vcmask 261120   ;;  %vm1508_vm11 = vcmask 293888  }
  0x1a   : > { %s2429_s5 = smov 16   ;;  %s2430_s10 = smov 20  }
  0x1b   : > { %s2258_s25 = smul.u32 432, %s176_s24  ;;  %s2431_s24 = smov 24  }
  0x1c   : > { %s2432_s27 = smov 28   ;;  %s2148_s6 = sshll.u32 %s2478_s16, 12 }
  0x1d   : > { %s2510_s28 = scalar_lea.vmem %s4129_s0, %s2258_s25  ;;  %s2434_s19 = smov [#allocation2]  }
  0x1e   : > { %v2513_v0 = vld [vmem:[%s2510_s28 + $0x18] sm:$0xff]  ;;  %v2516_v1 = vld [vmem:[%s2510_s28 + $0x20] sm:$0xff]  ;;  %v2524_v5 = vld [vmem:[%s2510_s28 + $0x8] sm:$0xff]  ;;  %s2334_s20 = sshll.u32 %s2434_s19, 4  ;;  %s2335_s20 = int_to_ptr.vmem [resolvable:$false] %s2334_s20 }
  0x1f   : > { %v2519_v2 = vld [vmem:[%s2510_s28] sm:$0xff]  ;;  %v289_v3 = vrot.slane %v2513_v0, 1  ;;  %v290_v4 = vrot.slane %v2516_v1, 1  ;;  %v2528_v7 = vld [vmem:[%s2510_s28 + $0x28] sm:$0x3]  ;;  %v285_v8 = vrot.slane %v2524_v5, 1 }
  0x20   : > { %4228 = vst [vmem:[#allocation8_spill] sm:$0xff] %v2519_v2  ;;  %v284_v6 = vrot.slane %v2519_v2, 1  ;;  %v292_v9 = vrot.slane %v2528_v7, 1  ;;  %v2533_v10 = vld [vmem:[%s2510_s28 + $0x10] sm:$0x3]  ;;  %v2536_v11 = vld [vmem:[%s2510_s28 + $0x38] sm:$0xff] }
  0x21   : > { %v2539_v12 = vsel %vm283_vm0, %v289_v3, %v290_v4  ;;  %v287_v13 = vrot.slane %v2533_v10, 1  ;;  %v2543_v14 = vld [vmem:[%s2510_s28 + $0x40] sm:$0x3]  ;;  %v2546_v15 = vld [vmem:[%s2510_s28 + $0x30] sm:$0xff]  ;;  %v295_v18 = vrot.slane %v2536_v11, 1  ;;  %v2566_v24 = vld [vmem:[%s2510_s28 + $0x48] sm:$0xff] }
  0x22   : > { %368 = vrot.lane.b32.xlu1 %v2539_v12, %s2426_s29  ;;  %v286_v16 = vsel %vm283_vm0, %v284_v6, %v285_v8  ;;  %v2553_v17 = vsel %vm283_vm0, %v290_v4, %v292_v9  ;;  %v297_v19 = vrot.slane %v2543_v14, 1  ;;  %v294_v21 = vrot.slane %v2546_v15, 1  ;;  %v2560_v22 = vld [vmem:[%s2510_s28 + $0x50] sm:$0xff]  ;;  %v2563_v23 = vld [vmem:[%s2510_s28 + $0x58] sm:$0x3]  ;;  %v2581_v30 = vld [vmem:[%s2510_s28 + $0x68] sm:$0xff] }
  0x23   : > { %364 = vrot.lane.b32.xlu0 %v286_v16, %s2426_s29  ;;  %v288_v20 = vsel %vm283_vm0, %v285_v8, %v287_v13  ;;  %v300_v26 = vrot.slane %v2560_v22, 1  ;;  %v302_v27 = vrot.slane %v2563_v23, 1  ;;  %v299_v29 = vrot.slane %v2566_v24, 1  ;;  %v2584_v31 = vld [vmem:[%s2510_s28 + $0x70] sm:$0x3]  ;;  %v2587_v32 = vld [vmem:[%s2510_s28 + $0x60] sm:$0xff] }
  0x24   : > { %v2572_v25 = vsel %vm283_vm0, %v295_v18, %v297_v19  ;;  %v2577_v28 = vsel %vm283_vm0, %v294_v21, %v295_v18  ;;  %v305_v34 = vrot.slane %v2581_v30, 1  ;;  %v307_v35 = vrot.slane %v2584_v31, 1  ;;  %v2603_v38 = vld [vmem:[%s2510_s28 + $0x80] sm:$0xff]  ;;  %v2606_v39 = vld [vmem:[%s2510_s28 + $0x88] sm:$0x3]  ;;  %v2609_v40 = vld [vmem:[%s2510_s28 + $0x78] sm:$0xff] }
  0x25   : > { %v2594_v33 = vsel %vm283_vm0, %v300_v26, %v302_v27  ;;  %v2599_v36 = vsel %vm283_vm0, %v299_v29, %v300_v26  ;;  %v304_v37 = vrot.slane %v2587_v32, 1  ;;  %v310_v42 = vrot.slane %v2603_v38, 1  ;;  %v2625_v46 = vld [vmem:[%s2510_s28 + $0x98] sm:$0xff]  ;;  %v2628_v47 = vld [vmem:[%s2510_s28 + $0xa0] sm:$0x3]  ;;  %v2631_v48 = vld [vmem:[%s2510_s28 + $0x90] sm:$0xff] }
  0x26   : > { %370 = vrot.lane.b32.xlu1 %v2553_v17, %s2426_s29  ;;  %4229 = vst [vmem:[#allocation9_spill] sm:$0xff] %v2594_v33  ;;  %v2616_v41 = vsel %vm283_vm0, %v305_v34, %v307_v35  ;;  %v312_v43 = vrot.slane %v2606_v39, 1  ;;  %v309_v45 = vrot.slane %v2609_v40, 1  ;;  %v315_v50 = vrot.slane %v2625_v46, 1  ;;  %v2647_v54 = vld [vmem:[%s2510_s28 + $0xb0] sm:$0xff]  ;;  %v2653_v56 = vld [vmem:[%s2510_s28 + $0xa8] sm:$0xff] }
  0x27   : > { %366 = vrot.lane.b32.xlu0 %v288_v20, %s2426_s29  ;;  %4230 = vst [vmem:[#allocation10_spill] sm:$0xff] %v2616_v41  ;;  %v2621_v44 = vsel %vm283_vm0, %v304_v37, %v305_v34  ;;  %v317_v51 = vrot.slane %v2628_v47, 1  ;;  %v314_v53 = vrot.slane %v2631_v48, 1  ;;  %v2650_v55 = vld [vmem:[%s2510_s28 + $0xb8] sm:$0x3]  ;;  %v320_v58 = vrot.slane %v2647_v54, 1 }
  0x28   : > { %4231 = vst [vmem:[#allocation11_spill] sm:$0xff] %v2621_v44  ;;  %v2638_v49 = vsel %vm283_vm0, %v310_v42, %v312_v43  ;;  %v2643_v52 = vsel %vm283_vm0, %v309_v45, %v310_v42  ;;  %v322_v59 = vrot.slane %v2650_v55, 1  ;;  %v319_v61 = vrot.slane %v2653_v56, 1  ;;  %v2669_v62 = vld [vmem:[%s2510_s28 + $0xc8] sm:$0xff]  ;;  %v2672_v63 = vld [vmem:[%s2510_s28 + $0xd0] sm:$0x3] }
  0x29   : > { %4232 = vst [vmem:[#allocation12_spill] sm:$0xff] %v2638_v49  ;;  %4233 = vst [vmem:[#allocation13_spill] sm:$0xff] %v2643_v52  ;;  %v2660_v57 = vsel %vm283_vm0, %v315_v50, %v317_v51  ;;  %v2665_v60 = vsel %vm283_vm0, %v314_v53, %v315_v50  ;;  %v2675_v3 = vld [vmem:[%s2510_s28 + $0xc0] sm:$0xff]  ;;  %v325_v6 = vrot.slane %v2669_v62, 1  ;;  %v327_v8 = vrot.slane %v2672_v63, 1  ;;  %v2697_v19 = vld [vmem:[%s2510_s28 + $0xd8] sm:$0xff] }
  0x2a   : > { %374 = vrot.lane.b32.xlu1 %v2572_v25, %s2426_s29  ;;  %4234 = vst [vmem:[#allocation14_spill] sm:$0xff] %v2660_v57  ;;  %4235 = vst [vmem:[#allocation15_spill] sm:$0xff] %v2665_v60  ;;  %v2682_v4 = vsel %vm283_vm0, %v320_v58, %v322_v59  ;;  %v2687_v9 = vsel %vm283_vm0, %v319_v61, %v320_v58  ;;  %v324_v13 = vrot.slane %v2675_v3, 1  ;;  %v2691_v16 = vld [vmem:[%s2510_s28 + $0xe0] sm:$0xff]  ;;  %v2694_v18 = vld [vmem:[%s2510_s28 + $0xe8] sm:$0x3] }
  0x2b   : > { %372 = vrot.lane.b32.xlu0 %v2577_v28, %s2426_s29  ;;  %4236 = vst [vmem:[#allocation16_spill] sm:$0xff] %v2682_v4  ;;  %4237 = vst [vmem:[#allocation17_spill] sm:$0xff] %v2687_v9  ;;  %v2704_v20 = vsel %vm283_vm0, %v325_v6, %v327_v8  ;;  %v330_v21 = vrot.slane %v2691_v16, 1  ;;  %v332_v26 = vrot.slane %v2694_v18, 1  ;;  %v329_v29 = vrot.slane %v2697_v19, 1  ;;  %v2713_v34 = vld [vmem:[%s2510_s28 + $0xf8] sm:$0xff] }
  0x2c   : > { %4238 = vst [vmem:[#allocation18_spill] sm:$0xff] %v2704_v20  ;;  %v2709_v27 = vsel %vm283_vm0, %v324_v13, %v325_v6  ;;  %v2716_v35 = vld [vmem:[%s2510_s28 + $0x100] sm:$0x3]  ;;  %v2719_v37 = vld [vmem:[%s2510_s28 + $0xf0] sm:$0xff]  ;;  %v335_v43 = vrot.slane %v2713_v34, 1  ;;  %v2741_v59 = vld [vmem:[%s2510_s28 + $0x108] sm:$0xff] }
  0x2d   : > { %4239 = vst [vmem:[#allocation19_spill] sm:$0xff] %v2709_v27  ;;  %v2726_v42 = vsel %vm283_vm0, %v330_v21, %v332_v26  ;;  %v337_v45 = vrot.slane %v2716_v35, 1  ;;  %v2731_v50 = vsel %vm283_vm0, %v329_v29, %v330_v21  ;;  %v334_v51 = vrot.slane %v2719_v37, 1  ;;  %v2735_v53 = vld [vmem:[%s2510_s28 + $0x110] sm:$0xff]  ;;  %v2738_v58 = vld [vmem:[%s2510_s28 + $0x118] sm:$0x3] }
  0x2e   : > { %378 = vrot.lane.b32.xlu1 %v2594_v33, %s2426_s29  ;;  %4240 = vst [vmem:[#allocation20_spill] sm:$0xff] %v2726_v42  ;;  %4241 = vst [vmem:[#allocation21_spill] sm:$0xff] %v2731_v50  ;;  %v340_v6 = vrot.slane %v2735_v53, 1  ;;  %v342_v8 = vrot.slane %v2738_v58, 1  ;;  %v339_v21 = vrot.slane %v2741_v59, 1  ;;  %v2757_v26 = vld [vmem:[%s2510_s28 + $0x128] sm:$0xff] }
  0x2f   : > { %376 = vrot.lane.b32.xlu0 %v2599_v36, %s2426_s29  ;;  %v2748_v61 = vsel %vm283_vm0, %v335_v43, %v337_v45  ;;  %v2753_v13 = vsel %vm283_vm0, %v334_v51, %v335_v43  ;;  %v2760_v29 = vld [vmem:[%s2510_s28 + $0x130] sm:$0x3]  ;;  %v345_v43 = vrot.slane %v2757_v26, 1 }
  0x30   : > { %4242 = vst [vmem:[#allocation22_spill] sm:$0xff] %v2748_v61  ;;  %4243 = vst [vmem:[#allocation23_spill] sm:$0xff] %v2753_v13  ;;  %v2770_v45 = vsel %vm283_vm0, %v340_v6, %v342_v8  ;;  %v347_v51 = vrot.slane %v2760_v29, 1 }
  0x31   : > { %4244 = vst [vmem:[#allocation24_spill] sm:$0xff] %v2770_v45 }
  0x32   : > { %382 = vrot.lane.b32.xlu1 %v2616_v41, %s2426_s29  ;;  %v2792_v8 = vsel %vm283_vm0, %v345_v43, %v347_v51  ;;  %v2826_v41 = vld [vmem:[%s2510_s28 + $0x178] sm:$0x3] }
  0x33   : > { %380 = vrot.lane.b32.xlu0 %v2621_v44, %s2426_s29  ;;  %4246 = vst [vmem:[#allocation26_spill] sm:$0xff] %v2792_v8 }
  0x36   : > { %386 = vrot.lane.b32.xlu1 %v2638_v49, %s2426_s29 }
  0x37   : > { %384 = vrot.lane.b32.xlu0 %v2643_v52, %s2426_s29  ;;  %v2823_v52 = vld [vmem:[%s2510_s28 + $0x170] sm:$0xff] }
  0x3a   : > { %390 = vrot.lane.b32.xlu1 %v2660_v57, %s2426_s29  ;;  %v2801_v57 = vld [vmem:[%s2510_s28 + $0x158] sm:$0xff] }
  0x3b   : > { %388 = vrot.lane.b32.xlu0 %v2665_v60, %s2426_s29 }
  0x3e   : > { %394 = vrot.lane.b32.xlu1 %v2682_v4, %s2426_s29 }
  0x3f   : > { %392 = vrot.lane.b32.xlu0 %v2687_v9, %s2426_s29 }
  0x42   : > { %398 = vrot.lane.b32.xlu1 %v2704_v20, %s2426_s29 }
  0x43   : > { %396 = vrot.lane.b32.xlu0 %v2709_v27, %s2426_s29  ;;  %v2779_v27 = vld [vmem:[%s2510_s28 + $0x140] sm:$0xff] }
  0x46   : > { %402 = vrot.lane.b32.xlu1 %v2726_v42, %s2426_s29  ;;  %v2763_v42 = vld [vmem:[%s2510_s28 + $0x120] sm:$0xff] }
  0x47   : > { %400 = vrot.lane.b32.xlu0 %v2731_v50, %s2426_s29  ;;  %v2775_v50 = vsel %vm283_vm0, %v339_v21, %v340_v6  ;;  %v344_v20 = vrot.slane %v2763_v42, 1  ;;  %v350_v6 = vrot.slane %v2779_v27, 1 }
  0x48   : > { %4245 = vst [vmem:[#allocation25_spill] sm:$0xff] %v2775_v50 }
  0x49   : > { %v2797_v4 = vsel %vm283_vm0, %v344_v20, %v345_v43  ;;  %v355_v20 = vrot.slane %v2801_v57, 1 }
  0x4a   : > { %406 = vrot.lane.b32.xlu1 %v2748_v61, %s2426_s29  ;;  %v2782_v61 = vld [vmem:[%s2510_s28 + $0x148] sm:$0x3]  ;;  %4247 = vst [vmem:[#allocation27_spill] sm:$0xff] %v2797_v4 }
  0x4b   : > { %404 = vrot.lane.b32.xlu0 %v2753_v13, %s2426_s29  ;;  %v2785_v13 = vld [vmem:[%s2510_s28 + $0x138] sm:$0xff]  ;;  %v352_v21 = vrot.slane %v2782_v61, 1 }
  0x4c   : > { %v349_v9 = vrot.slane %v2785_v13, 1 }
  0x4d   : > { %v2814_v51 = vsel %vm283_vm0, %v350_v6, %v352_v21 }
  0x4e   : > { %410 = vrot.lane.b32.xlu1 %v2770_v45, %s2426_s29  ;;  %v2804_v45 = vld [vmem:[%s2510_s28 + $0x160] sm:$0x3]  ;;  %4248 = vst [vmem:[#allocation28_spill] sm:$0xff] %v2814_v51  ;;  %v2819_v60 = vsel %vm283_vm0, %v349_v9, %v350_v6  ;;  %v360_v9 = vrot.slane %v2823_v52, 1  ;;  %v362_v6 = vrot.slane %v2826_v41, 1 }
  0x4f   : > { %408 = vrot.lane.b32.xlu0 %v2775_v50, %s2426_s29  ;;  %v2807_v50 = vld [vmem:[%s2510_s28 + $0x150] sm:$0xff]  ;;  %v357_v43 = vrot.slane %v2804_v45, 1  ;;  %4249 = vst [vmem:[#allocation29_spill] sm:$0xff] %v2819_v60 }
  0x50   : > { %v354_v49 = vrot.slane %v2807_v50, 1 }
  0x51   : > { %v2836_v21 = vsel %vm283_vm0, %v355_v20, %v357_v43  ;;  %v462_v43 = vrot.slane %v2524_v5, 2  ;;  %v469_v5 = vrot.slane %v2528_v7, 2  ;;  %v471_v7 = vrot.slane %v2546_v15, 2 }
  0x52   : > { %414 = vrot.lane.b32.xlu1 %v2792_v8, %s2426_s29  ;;  %v2829_v8 = vld [vmem:[%s2510_s28 + $0x168] sm:$0xff]  ;;  %4250 = vst [vmem:[#allocation30_spill] sm:$0xff] %v2836_v21 }
  0x53   : > { %412 = vrot.lane.b32.xlu0 %v2797_v4, %s2426_s29  ;;  %v2841_v4 = vsel %vm283_vm0, %v354_v49, %v355_v20  ;;  %v359_v44 = vrot.slane %v2829_v8, 1  ;;  %v461_v49 = vrot.slane %v2519_v2, 2  ;;  %v504_v2 = vrot.slane %v2672_v63, 2 }
  0x54   : > { %4251 = vst [vmem:[#allocation31_spill] sm:$0xff] %v2841_v4 }
  0x55   : > { %v2854_v33 = vsel %vm283_vm0, %v359_v44, %v360_v9  ;;  %v466_v44 = vrot.slane %v2513_v0, 2 }
  0x56   : > { %418 = vrot.lane.b32.xlu1 %v2814_v51, %s2426_s29  ;;  %v2849_v51 = vsel %vm283_vm0, %v360_v9, %v362_v6  ;;  %4253 = vst [vmem:[#allocation33_spill] sm:$0xff] %v2854_v33  ;;  %v467_v6 = vrot.slane %v2516_v1, 2 }
  0x57   : > { %416 = vrot.lane.b32.xlu0 %v2819_v60, %s2426_s29  ;;  %4252 = vst [vmem:[#allocation32_spill] sm:$0xff] %v2849_v51  ;;  %v464_v60 = vrot.slane %v2533_v10, 2  ;;  %v463_v10 = vsel %vm460_vm1, %v461_v49, %v462_v43  ;;  %v477_v49 = vrot.slane %v2560_v22, 2 }
  0x58   : > { %v2869_v9 = vsel %vm460_vm1, %v467_v6, %v469_v5 }
  0x59   : > { %v465_v20 = vsel %vm460_vm1, %v462_v43, %v464_v60  ;;  %v474_v60 = vrot.slane %v2543_v14, 2 }
  0x5a   : > { %422 = vrot.lane.b32.xlu1 %v2836_v21, %s2426_s29  ;;  %v494_v21 = vrot.slane %v2628_v47, 2 }
  0x5b   : > { %420 = vrot.lane.b32.xlu0 %v2841_v4, %s2426_s29  ;;  %v499_v4 = vrot.slane %v2650_v55, 2 }
  0x5e   : > { %426 = vrot.lane.b32.xlu1 %v2849_v51, %s2426_s29  ;;  %v472_v51 = vrot.slane %v2536_v11, 2 }
  0x5f   : > { %424 = vrot.lane.b32.xlu0 %v2854_v33, %s2426_s29  ;;  %v2874_v33 = vsel %vm460_vm1, %v466_v44, %v467_v6  ;;  %v476_v6 = vrot.slane %v2566_v24, 2  ;;  %v484_v44 = vrot.slane %v2584_v31, 2  ;;  %s2433_s29 = smov 32  }
  0x60   : > { %v2882_v43 = vsel %vm460_vm1, %v472_v51, %v474_v60  ;;  %v2887_v14 = vsel %vm460_vm1, %v471_v7, %v472_v51  ;;  %v481_v51 = vrot.slane %v2587_v32, 2  ;;  %v487_v7 = vrot.slane %v2603_v38, 2 }
  0x62   : > { %543 = vrot.lane.b32.xlu1 %v465_v20, %s2427_s30  ;;  %v479_v20 = vrot.slane %v2563_v23, 2  ;;  %v2900_v23 = vsel %vm460_vm1, %v476_v6, %v477_v49 }
  0x63   : > { %541 = vrot.lane.b32.xlu0 %v463_v10, %s2427_s30  ;;  %v482_v10 = vrot.slane %v2581_v30, 2 }
  0x64   : > { %v2895_v5 = vsel %vm460_vm1, %v477_v49, %v479_v20  ;;  %v489_v20 = vrot.slane %v2606_v39, 2  ;;  %v486_v49 = vrot.slane %v2609_v40, 2 }
  0x65   : > { %v2908_v60 = vsel %vm460_vm1, %v482_v10, %v484_v44  ;;  %v2913_v31 = vsel %vm460_vm1, %v481_v51, %v482_v10  ;;  %v492_v44 = vrot.slane %v2625_v46, 2  ;;  %v491_v10 = vrot.slane %v2631_v48, 2 }
  0x66   : > { %547 = vrot.lane.b32.xlu1 %v2869_v9, %s2427_s30  ;;  %v2921_v6 = vsel %vm460_vm1, %v487_v7, %v489_v20  ;;  %v2926_v39 = vsel %vm460_vm1, %v486_v49, %v487_v7  ;;  %v497_v20 = vrot.slane %v2647_v54, 2  ;;  %v496_v7 = vrot.slane %v2653_v56, 2 }
  0x67   : > { %545 = vrot.lane.b32.xlu0 %v2874_v33, %s2427_s30  ;;  %4254 = vst [vmem:[#allocation34_spill] sm:$0xff] %v2921_v6  ;;  %v2934_v51 = vsel %vm460_vm1, %v492_v44, %v494_v21  ;;  %v2939_v47 = vsel %vm460_vm1, %v491_v10, %v492_v44  ;;  %v502_v21 = vrot.slane %v2669_v62, 2  ;;  %v501_v44 = vrot.slane %v2675_v3, 2 }
  0x68   : > { %4255 = vst [vmem:[#allocation35_spill] sm:$0xff] %v2934_v51  ;;  %4256 = vst [vmem:[#allocation36_spill] sm:$0xff] %v2939_v47  ;;  %v2947_v49 = vsel %vm460_vm1, %v497_v20, %v499_v4  ;;  %v2952_v55 = vsel %vm460_vm1, %v496_v7, %v497_v20  ;;  %v507_v4 = vrot.slane %v2691_v16, 2  ;;  %v506_v20 = vrot.slane %v2697_v19, 2 }
  0x69   : > { %4257 = vst [vmem:[#allocation37_spill] sm:$0xff] %v2947_v49  ;;  %4258 = vst [vmem:[#allocation38_spill] sm:$0xff] %v2952_v55  ;;  %v2960_v10 = vsel %vm460_vm1, %v502_v21, %v504_v2  ;;  %v2965_v63 = vsel %vm460_vm1, %v501_v44, %v502_v21  ;;  %v512_v2 = vrot.slane %v2713_v34, 2  ;;  %v511_v21 = vrot.slane %v2719_v37, 2 }
  0x6a   : > { %551 = vrot.lane.b32.xlu1 %v2882_v43, %s2427_s30  ;;  %4259 = vst [vmem:[#allocation39_spill] sm:$0xff] %v2960_v10  ;;  %4260 = vst [vmem:[#allocation40_spill] sm:$0xff] %v2965_v63 }
  0x6b   : > { %549 = vrot.lane.b32.xlu0 %v2887_v14, %s2427_s30 }
  0x6e   : > { %555 = vrot.lane.b32.xlu1 %v2895_v5, %s2427_s30 }
  0x6f   : > { %553 = vrot.lane.b32.xlu0 %v2900_v23, %s2427_s30 }
  0x72   : > { %559 = vrot.lane.b32.xlu1 %v2908_v60, %s2427_s30 }
  0x73   : > { %557 = vrot.lane.b32.xlu0 %v2913_v31, %s2427_s30 }
  0x76   : > { %563 = vrot.lane.b32.xlu1 %v2921_v6, %s2427_s30 }
  0x77   : > { %561 = vrot.lane.b32.xlu0 %v2926_v39, %s2427_s30 }
  0x7a   : > { %567 = vrot.lane.b32.xlu1 %v2934_v51, %s2427_s30  ;;  %v509_v51 = vrot.slane %v2694_v18, 2  ;;  %v2978_v18 = vsel %vm460_vm1, %v506_v20, %v507_v4 }
  0x7b   : > { %565 = vrot.lane.b32.xlu0 %v2939_v47, %s2427_s30  ;;  %4262 = vst [vmem:[#allocation42_spill] sm:$0xff] %v2978_v18 }
  0x7c   : > { %v2973_v7 = vsel %vm460_vm1, %v507_v4, %v509_v51  ;;  %v517_v51 = vrot.slane %v2735_v53, 2  ;;  %v516_v4 = vrot.slane %v2741_v59, 2 }
  0x7d   : > { %4261 = vst [vmem:[#allocation41_spill] sm:$0xff] %v2973_v7 }
  0x7e   : > { %571 = vrot.lane.b32.xlu1 %v2947_v49, %s2427_s30  ;;  %v514_v49 = vrot.slane %v2716_v35, 2  ;;  %v2991_v35 = vsel %vm460_vm1, %v511_v21, %v512_v2 }
  0x7f   : > { %569 = vrot.lane.b32.xlu0 %v2952_v55, %s2427_s30  ;;  %4264 = vst [vmem:[#allocation44_spill] sm:$0xff] %v2991_v35 }
  0x80   : > { %v2986_v44 = vsel %vm460_vm1, %v512_v2, %v514_v49  ;;  %v522_v49 = vrot.slane %v2757_v26, 2  ;;  %v521_v2 = vrot.slane %v2763_v42, 2 }
  0x81   : > { %4263 = vst [vmem:[#allocation43_spill] sm:$0xff] %v2986_v44 }
  0x82   : > { %575 = vrot.lane.b32.xlu1 %v2960_v10, %s2427_s30  ;;  %v519_v10 = vrot.slane %v2738_v58, 2  ;;  %v3004_v58 = vsel %vm460_vm1, %v516_v4, %v517_v51 }
  0x83   : > { %573 = vrot.lane.b32.xlu0 %v2965_v63, %s2427_s30  ;;  %4266 = vst [vmem:[#allocation46_spill] sm:$0xff] %v3004_v58  ;;  %v1504_v63 = vld [vmem:[%s4130_s1 + $0x8] sm:$0xff] }
  0x84   : > { %v2999_v20 = vsel %vm460_vm1, %v517_v51, %v519_v10  ;;  %v527_v10 = vrot.slane %v2779_v27, 2  ;;  %v526_v51 = vrot.slane %v2785_v13, 2 }
  0x85   : > { %4265 = vst [vmem:[#allocation45_spill] sm:$0xff] %v2999_v20 }
  0x86   : > { %579 = vrot.lane.b32.xlu1 %v2973_v7, %s2427_s30  ;;  %v524_v7 = vrot.slane %v2760_v29, 2  ;;  %v3017_v29 = vsel %vm460_vm1, %v521_v2, %v522_v49 }
  0x87   : > { %577 = vrot.lane.b32.xlu0 %v2978_v18, %s2427_s30  ;;  %4268 = vst [vmem:[#allocation48_spill] sm:$0xff] %v3017_v29 }
  0x88   : > { %v3012_v21 = vsel %vm460_vm1, %v522_v49, %v524_v7  ;;  %v532_v7 = vrot.slane %v2801_v57, 2  ;;  %v531_v49 = vrot.slane %v2807_v50, 2 }
  0x89   : > { %4267 = vst [vmem:[#allocation47_spill] sm:$0xff] %v3012_v21 }
  0x8a   : > { %583 = vrot.lane.b32.xlu1 %v2986_v44, %s2427_s30  ;;  %v529_v44 = vrot.slane %v2782_v61, 2  ;;  %v3032_v61 = vsel %vm460_vm1, %v526_v51, %v527_v10  ;;  %v536_v51 = vrot.slane %v2829_v8, 2 }
  0x8b   : > { %581 = vrot.lane.b32.xlu0 %v2991_v35, %s2427_s30  ;;  %4271 = vst [vmem:[#allocation51_spill] sm:$0xff] %v3032_v61 }
  0x8c   : > { %v3025_v4 = vsel %vm460_vm1, %v527_v10, %v529_v44  ;;  %v3049_v10 = vsel %vm460_vm1, %v531_v49, %v532_v7 }
  0x8d   : > { %4269 = vst [vmem:[#allocation49_spill] sm:$0xff] %v3025_v4  ;;  %4275 = vst [vmem:[#allocation55_spill] sm:$0xff] %v3049_v10 }
  0x8e   : > { %587 = vrot.lane.b32.xlu1 %v2999_v20, %s2427_s30  ;;  %v534_v20 = vrot.slane %v2804_v45, 2  ;;  %v537_v45 = vrot.slane %v2823_v52, 2 }
  0x8f   : > { %585 = vrot.lane.b32.xlu0 %v3004_v58, %s2427_s30 }
  0x90   : > { %v3042_v44 = vsel %vm460_vm1, %v532_v7, %v534_v20 }
  0x91   : > { %4273 = vst [vmem:[#allocation53_spill] sm:$0xff] %v3042_v44 }
  0x92   : > { %591 = vrot.lane.b32.xlu1 %v3012_v21, %s2427_s30  ;;  %v539_v21 = vrot.slane %v2826_v41, 2  ;;  %v3064_v41 = vsel %vm460_vm1, %v536_v51, %v537_v45 }
  0x93   : > { %589 = vrot.lane.b32.xlu0 %v3017_v29, %s2427_s30  ;;  %4279 = vst [vmem:[#allocation59_spill] sm:$0xff] %v3064_v41 }
  0x94   : > { %v3029_v58 = vpop.permute.xlu1 %368  ;;  %v3059_v20 = vsel %vm460_vm1, %v537_v45, %v539_v21 }
  0x95   : > { %4270 = vst [vmem:[#allocation50_spill] sm:$0xff] %v3029_v58  ;;  %v3035_v2 = vpop.permute.xlu0 %364  ;;  %4277 = vst [vmem:[#allocation57_spill] sm:$0xff] %v3059_v20  ;;  %v1503_v58 = vld [vmem:[%s4130_s1] sm:$0xff] }
  0x96   : > { %4272 = vst [vmem:[#allocation52_spill] sm:$0xff] %v3035_v2  ;;  %595 = vrot.lane.b32.xlu1 %v3025_v4, %s2427_s30 }
  0x97   : > { %593 = vrot.lane.b32.xlu0 %v3032_v61, %s2427_s30 }
  0x98   : > { %v3046_v29 = vpop.permute.xlu1 %370 }
  0x99   : > { %4274 = vst [vmem:[#allocation54_spill] sm:$0xff] %v3046_v29  ;;  %v3052_v35 = vpop.permute.xlu0 %366 }
  0x9a   : > { %4276 = vst [vmem:[#allocation56_spill] sm:$0xff] %v3052_v35  ;;  %599 = vrot.lane.b32.xlu1 %v3042_v44, %s2427_s30  ;;  %v2244_v35 = vpack.c.bf16 %v1504_v63, %v1503_v58 }
  0x9b   : > { %597 = vrot.lane.b32.xlu0 %v3049_v10, %s2427_s30 }
  0x9c   : > { %v3061_v4 = vpop.permute.xlu1 %374  ;;  %2245 = vmatprep.subr.bf16.mxu0 %v2244_v35  ;;  %2252 = vmatprep.subr.bf16.mxu1 %v2244_v35 }
  0x9d   : > { %4278 = vst [vmem:[#allocation58_spill] sm:$0xff] %v3061_v4  ;;  %v3066_v7 = vpop.permute.xlu0 %372  ;;  %2247 = vmatpush3.bf16.msra.mxu0 %v2244_v35  ;;  %2255 = vmatpush3.bf16.msra.mxu1 %v2244_v35 }
  0x9e   : > { %4280 = vst [vmem:[#allocation60_spill] sm:$0xff] %v3066_v7  ;;  %603 = vrot.lane.b32.xlu1 %v3059_v20, %s2427_s30 }
  0x9f   : > { %601 = vrot.lane.b32.xlu0 %v3064_v41, %s2427_s30 }
  0xa0   : > { %v3072_v49 = vpop.permute.xlu1 %378 }
  0xa1   : > { %v3074_v44 = vpop.permute.xlu0 %376 }
  0xa2   : > { %4281 = vst [vmem:[#allocation61_spill] sm:$0xff] %v3074_v44  ;;  %641 = vrot.lane.b32.xlu1 %v2516_v1, %s2428_s4 }
  0xa3   : > { %639 = vrot.lane.b32.xlu0 %v2513_v0, %s2428_s4 }
  0xa4   : > { %v3080_v21 = vpop.permute.xlu1 %382 }
  0xa5   : > { %v3082_v45 = vpop.permute.xlu0 %380 }
  0xa6   : > { %645 = vrot.lane.b32.xlu1 %v2536_v11, %s2428_s4 }
  0xa7   : > { %643 = vrot.lane.b32.xlu0 %v2546_v15, %s2428_s4 }
  0xa8   : > { %v3088_v51 = vpop.permute.xlu1 %386 }
  0xa9   : > { %v3090_v20 = vpop.permute.xlu0 %384 }
  0xaa   : > { %649 = vrot.lane.b32.xlu1 %v2560_v22, %s2428_s4 }
  0xab   : > { %647 = vrot.lane.b32.xlu0 %v2566_v24, %s2428_s4 }
  0xac   : > { %v3096_v0 = vpop.permute.xlu1 %390 }
  0xad   : > { %v3098_v1 = vpop.permute.xlu0 %388 }
  0xae   : > { %653 = vrot.lane.b32.xlu1 %v2581_v30, %s2428_s4 }
  0xaf   : > { %651 = vrot.lane.b32.xlu0 %v2587_v32, %s2428_s4 }
  0xb0   : > { %v3104_v41 = vpop.permute.xlu1 %394 }
  0xb1   : > { %v3106_v10 = vpop.permute.xlu0 %392 }
  0xb2   : > { %657 = vrot.lane.b32.xlu1 %v2603_v38, %s2428_s4 }
  0xb3   : > { %655 = vrot.lane.b32.xlu0 %v2609_v40, %s2428_s4 }
  0xb4   : > { %v3112_v61 = vpop.permute.xlu1 %398 }
  0xb5   : > { %v3114_v44 = vpop.permute.xlu0 %396 }
  0xb6   : > { %661 = vrot.lane.b32.xlu1 %v2625_v46, %s2428_s4 }
  0xb7   : > { %659 = vrot.lane.b32.xlu0 %v2631_v48, %s2428_s4 }
  0xb8   : > { %v3120_v4 = vpop.permute.xlu1 %402 }
  0xb9   : > { %v3122_v18 = vpop.permute.xlu0 %400 }
  0xba   : > { %665 = vrot.lane.b32.xlu1 %v2647_v54, %s2428_s4 }
  0xbb   : > { %663 = vrot.lane.b32.xlu0 %v2653_v56, %s2428_s4 }
  0xbc   : > { %v3128_v7 = vpop.permute.xlu1 %406 }
  0xbd   : > { %v3130_v29 = vpop.permute.xlu0 %404 }
  0xbe   : > { %743 = vrot.lane.b32.xlu1 %v2553_v17, %s2429_s5  ;;  %v1505_v17 = vld [vmem:[%s4130_s1 + $0x10] sm:$0xff] }
  0xbf   : > { %741 = vrot.lane.b32.xlu0 %v2539_v12, %s2429_s5  ;;  %v1506_v12 = vld [vmem:[%s4130_s1 + $0x18] sm:$0xff] }
  0xc0   : > { %v3142_v2 = vpop.permute.xlu1 %410  ;;  %v2248_v63 = vpack.c.bf16 %v1506_v12, %v1505_v17 }
  0xc1   : > { %v3144_v55 = vpop.permute.xlu0 %408 }
  0xc2   : > { %844 = vrot.lane.b32.xlu1 %v2869_v9, %s2430_s10  ;;  %2249 = vmatprep.subr.bf16.mxu0 %v2248_v63 }
  0xc3   : > { %842 = vrot.lane.b32.xlu0 %v2874_v33, %s2430_s10  ;;  %2253 = vmatprep.subr.bf16.mxu1 %v2248_v63  ;;  %v1507_v33 = vld [vmem:[%s4130_s1 + $0x20] sm:$0xf] }
  0xc4   : > { %v3156_v58 = vpop.permute.xlu1 %414  ;;  %2251 = vmatpush3.bf16.msra.mxu0 %v2248_v63  ;;  %2256 = vmatpush3.bf16.msra.mxu1 %v2248_v63 }
  0xc5   : > { %v3158_v47 = vpop.permute.xlu0 %412  ;;  %2194 = vmatprep.subr.msk.mxu0 %vm1605_vm2, %v1507_v33  ;;  %2254 = vmatprep.subr.msk.mxu1 %vm1605_vm2, %v1507_v33 }
  0xc6   : > { %942 = vrot.lane.b32.xlu1 %v2536_v11, %s2431_s24 }
  0xc7   : > { %940 = vrot.lane.b32.xlu0 %v2546_v15, %s2431_s24 }
  0xc8   : > { %v3167_v9 = vpop.permute.xlu1 %418  ;;  %2195 = vmatpush3.msk.msra.mxu0 %vm1605_vm2, %v1507_v33  ;;  %2257 = vmatpush3.msk.msra.mxu1 %vm1605_vm2, %v1507_v33 }
  0xc9   : > { %v3169_v35 = vpop.permute.xlu0 %416 }
  0xca   : > { %745 = vrot.lane.b32.xlu1 %v2577_v28, %s2429_s5 }
  0xcb   : > { %1042 = vrot.lane.b32.xlu0 %v2577_v28, %s2432_s27 }
  0xcc   : > { %v3175_v11 = vpop.permute.xlu1 %422 }
  0xcd   : > { %v3177_v15 = vpop.permute.xlu0 %420 }
  0xce   : > { %1143 = vrot.lane.b32.xlu1 %v2887_v14, %s2433_s29 }
  0xcf   : > { %1044 = vrot.lane.b32.xlu0 %v2572_v25, %s2432_s27 }
  0xd0   : > { %v3183_v17 = vpop.permute.xlu1 %426 }
  0xd1   : > { %v3185_v12 = vpop.permute.xlu0 %424 }
  0xd2   : > { %846 = vrot.lane.b32.xlu1 %v2887_v14, %s2430_s10 }
  0xd3   : > { %747 = vrot.lane.b32.xlu0 %v2572_v25, %s2429_s5 }
  0xd4   : > { %v3191_v28 = vpop.permute.xlu1 %543 }
  0xd5   : > { %v3193_v63 = vpop.permute.xlu0 %541 }
  0xd6   : > { %848 = vrot.lane.b32.xlu1 %v2882_v43, %s2430_s10 }
  0xd7   : > { %1145 = vrot.lane.b32.xlu0 %v2882_v43, %s2433_s29  ;;  %v1247_v43 = vsel %vm1239_vm3, %v2560_v22, %v3072_v49 }
  0xd8   : > { %v3199_v33 = vpop.permute.xlu1 %547 }
  0xd9   : > { %4282 = vst [vmem:[#allocation62_spill] sm:$0xff] %v3199_v33  ;;  %v3201_v6 = vpop.permute.xlu0 %545 }
  0xda   : > { %4283 = vst [vmem:[#allocation63_spill] sm:$0xff] %v3201_v6  ;;  %946 = vrot.lane.b32.xlu1 %v2560_v22, %s2431_s24  ;;  %v1248_v22 = vsel %vm1239_vm3, %v2587_v32, %v3082_v45  ;;  %v1250_v45 = vsel %vm1239_vm3, %v2609_v40, %v3090_v20 }
  0xdb   : > { %944 = vrot.lane.b32.xlu0 %v2566_v24, %s2431_s24 }
  0xdc   : > { %v3207_v25 = vpop.permute.xlu1 %551 }
  0xdd   : > { %4284 = vst [vmem:[#allocation64_spill] sm:$0xff] %v3207_v25  ;;  %v3209_v14 = vpop.permute.xlu0 %549  ;;  %v4287_v25 = vld [vmem:[#allocation9_spill] sm:$0xff] }
  0xde   : > { %4285 = vst [vmem:[#allocation65_spill] sm:$0xff] %v3209_v14  ;;  %749 = vrot.lane.b32.xlu1 %v2599_v36, %s2429_s5 }
  0xdf   : > { %1046 = vrot.lane.b32.xlu0 %v2599_v36, %s2432_s27  ;;  %v1249_v36 = vsel %vm1239_vm3, %v2581_v30, %v3080_v21  ;;  %v1251_v21 = vsel %vm1239_vm3, %v2603_v38, %v3088_v51 }
  0xe0   : > { %v556_v33 = vpop.permute.xlu1 %555 }
  0xe1   : > { %v3219_v6 = vsel %vm1272_vm4, %v1247_v43, %v556_v33  ;;  %v3221_v24 = vpop.permute.xlu0 %553 }
  0xe2   : > { %4286 = vst [vmem:[#allocation66_spill] sm:$0xff] %v3219_v6  ;;  %1147 = vrot.lane.b32.xlu1 %v2900_v23, %s2433_s29 }
  0xe3   : > { %1048 = vrot.lane.b32.xlu0 %v4287_v25, %s2432_s27 }
  0xe4   : > { %v560_v14 = vpop.permute.xlu1 %559 }
  0xe5   : > { %v3234_v49 = vsel %vm1272_vm4, %v1249_v36, %v560_v14  ;;  %v558_v33 = vpop.permute.xlu0 %557 }
  0xe6   : > { %v3237_v43 = vsel %vm1272_vm4, %v1248_v22, %v558_v33  ;;  %850 = vrot.lane.b32.xlu1 %v2900_v23, %s2430_s10  ;;  %v1253_v23 = vsel %vm1239_vm3, %v2625_v46, %v3096_v0 }
  0xe7   : > { %751 = vrot.lane.b32.xlu0 %v4287_v25, %s2429_s5 }
  0xe8   : > { %v564_v6 = vpop.permute.xlu1 %563 }
  0xe9   : > { %v3250_v14 = vsel %vm1272_vm4, %v1251_v21, %v564_v6  ;;  %v562_v36 = vpop.permute.xlu0 %561  ;;  %v1252_v6 = vsel %vm1239_vm3, %v2631_v48, %v3098_v1  ;;  %v1254_v1 = vsel %vm1239_vm3, %v2653_v56, %v3106_v10  ;;  %v1256_v10 = vsel %vm1239_vm3, %v2675_v3, %v3114_v44 }
  0xea   : > { %v3253_v22 = vsel %vm1272_vm4, %v1250_v45, %v562_v36  ;;  %852 = vrot.lane.b32.xlu1 %v2895_v5, %s2430_s10  ;;  %v1258_v44 = vsel %vm1239_vm3, %v2697_v19, %v3122_v18  ;;  %v1260_v18 = vsel %vm1239_vm3, %v2719_v37, %v3130_v29  ;;  %v1262_v37 = vsel %vm1239_vm3, %v2741_v59, %v3144_v55 }
  0xeb   : > { %1149 = vrot.lane.b32.xlu0 %v2895_v5, %s2433_s29  ;;  %v1255_v5 = vsel %vm1239_vm3, %v2647_v54, %v3104_v41  ;;  %v1264_v59 = vsel %vm1239_vm3, %v2763_v42, %v3158_v47  ;;  %v1266_v42 = vsel %vm1239_vm3, %v2785_v13, %v3169_v35  ;;  %v1268_v13 = vsel %vm1239_vm3, %v2807_v50, %v3177_v15 }
  0xec   : > { %v568_v51 = vpop.permute.xlu1 %567  ;;  %v1270_v50 = vsel %vm1239_vm3, %v2829_v8, %v3185_v12  ;;  %v4293_v12 = vld [vmem:[#allocation15_spill] sm:$0xff] }
  0xed   : > { %v3266_v20 = vsel %vm1272_vm4, %v1253_v23, %v568_v51  ;;  %v566_v25 = vpop.permute.xlu0 %565 }
  0xee   : > { %v3269_v33 = vsel %vm1272_vm4, %v1252_v6, %v566_v25  ;;  %950 = vrot.lane.b32.xlu1 %v2581_v30, %s2431_s24  ;;  %v4288_v30 = vld [vmem:[#allocation11_spill] sm:$0xff]  ;;  %v4289_v25 = vld [vmem:[#allocation10_spill] sm:$0xff] }
  0xef   : > { %948 = vrot.lane.b32.xlu0 %v2587_v32, %s2431_s24  ;;  %v1257_v32 = vsel %vm1239_vm3, %v2669_v62, %v3112_v61  ;;  %v1259_v61 = vsel %vm1239_vm3, %v2691_v16, %v3120_v4  ;;  %v1261_v4 = vsel %vm1239_vm3, %v2713_v34, %v3128_v7  ;;  %v1263_v34 = vsel %vm1239_vm3, %v2735_v53, %v3142_v2 }
  0xf0   : > { %v572_v0 = vpop.permute.xlu1 %571  ;;  %v1265_v53 = vsel %vm1239_vm3, %v2757_v26, %v3156_v58 }
  0xf1   : > { %v3282_v21 = vsel %vm1272_vm4, %v1255_v5, %v572_v0  ;;  %v570_v45 = vpop.permute.xlu0 %569 }
  0xf2   : > { %v3285_v36 = vsel %vm1272_vm4, %v1254_v1, %v570_v45  ;;  %753 = vrot.lane.b32.xlu1 %v4288_v30, %s2429_s5 }
  0xf3   : > { %1050 = vrot.lane.b32.xlu0 %v4288_v30, %s2432_s27 }
  0xf4   : > { %v576_v41 = vpop.permute.xlu1 %575 }
  0xf5   : > { %v3298_v23 = vsel %vm1272_vm4, %v1257_v32, %v576_v41  ;;  %v574_v51 = vpop.permute.xlu0 %573 }
  0xf6   : > { %v3301_v6 = vsel %vm1272_vm4, %v1256_v10, %v574_v51  ;;  %1151 = vrot.lane.b32.xlu1 %v2913_v31, %s2433_s29 }
  0xf7   : > { %1052 = vrot.lane.b32.xlu0 %v4289_v25, %s2432_s27 }
  0xf8   : > { %v580_v5 = vpop.permute.xlu1 %579 }
  0xf9   : > { %v3314_v0 = vsel %vm1272_vm4, %v1259_v61, %v580_v5  ;;  %v578_v1 = vpop.permute.xlu0 %577  ;;  %v4291_v5 = vld [vmem:[#allocation12_spill] sm:$0xff] }
  0xfa   : > { %v3317_v45 = vsel %vm1272_vm4, %v1258_v44, %v578_v1  ;;  %854 = vrot.lane.b32.xlu1 %v2913_v31, %s2430_s10 }
  0xfb   : > { %755 = vrot.lane.b32.xlu0 %v4289_v25, %s2429_s5 }
  0xfc   : > { %v584_v30 = vpop.permute.xlu1 %583 }
  0xfd   : > { %v3330_v32 = vsel %vm1272_vm4, %v1261_v4, %v584_v30  ;;  %v582_v41 = vpop.permute.xlu0 %581 }
  0xfe   : > { %v3333_v10 = vsel %vm1272_vm4, %v1260_v18, %v582_v41  ;;  %856 = vrot.lane.b32.xlu1 %v2908_v60, %s2430_s10 }
  0xff   : > { %1153 = vrot.lane.b32.xlu0 %v2908_v60, %s2433_s29 }
 0x100   : > { %v588_v31 = vpop.permute.xlu1 %587 }
 0x101   : > { %v3346_v29 = vsel %vm1272_vm4, %v1263_v34, %v588_v31  ;;  %v586_v7 = vpop.permute.xlu0 %585  ;;  %v4294_v31 = vld [vmem:[#allocation36_spill] sm:$0xff] }
 0x102   : > { %v3349_v51 = vsel %vm1272_vm4, %v1262_v37, %v586_v7  ;;  %954 = vrot.lane.b32.xlu1 %v2603_v38, %s2431_s24  ;;  %v4290_v38 = vld [vmem:[#allocation13_spill] sm:$0xff] }
 0x103   : > { %952 = vrot.lane.b32.xlu0 %v2609_v40, %s2431_s24  ;;  %v1267_v40 = vsel %vm1239_vm3, %v2779_v27, %v3167_v9  ;;  %v1269_v27 = vsel %vm1239_vm3, %v2801_v57, %v3175_v11  ;;  %v1271_v57 = vsel %vm1239_vm3, %v2823_v52, %v3183_v17 }
 0x104   : > { %v592_v60 = vpop.permute.xlu1 %591 }
 0x105   : > { %v3362_v55 = vsel %vm1272_vm4, %v1265_v53, %v592_v60  ;;  %v590_v2 = vpop.permute.xlu0 %589  ;;  %v4296_v60 = vld [vmem:[#allocation35_spill] sm:$0xff] }
 0x106   : > { %v3365_v25 = vsel %vm1272_vm4, %v1264_v59, %v590_v2  ;;  %757 = vrot.lane.b32.xlu1 %v4290_v38, %s2429_s5 }
 0x107   : > { %1054 = vrot.lane.b32.xlu0 %v4290_v38, %s2432_s27 }
 0x108   : > { %v596_v26 = vpop.permute.xlu1 %595 }
 0x109   : > { %v3378_v47 = vsel %vm1272_vm4, %v1267_v40, %v596_v26  ;;  %v594_v58 = vpop.permute.xlu0 %593  ;;  %v4297_v26 = vld [vmem:[#allocation17_spill] sm:$0xff] }
 0x10a   : > { %v3381_v61 = vsel %vm1272_vm4, %v1266_v42, %v594_v58  ;;  %1155 = vrot.lane.b32.xlu1 %v2926_v39, %s2433_s29 }
 0x10b   : > { %1056 = vrot.lane.b32.xlu0 %v4291_v5, %s2432_s27 }
 0x10c   : > { %v600_v9 = vpop.permute.xlu1 %599 }
 0x10d   : > { %v3394_v35 = vsel %vm1272_vm4, %v1269_v27, %v600_v9  ;;  %v598_v44 = vpop.permute.xlu0 %597 }
 0x10e   : > { %v3397_v1 = vsel %vm1272_vm4, %v1268_v13, %v598_v44  ;;  %858 = vrot.lane.b32.xlu1 %v2926_v39, %s2430_s10  ;;  %v4292_v39 = vld [vmem:[#allocation34_spill] sm:$0xff]  ;;  %v4300_v44 = vld [vmem:[#allocation52_spill] sm:$0xff] }
 0x10f   : > { %759 = vrot.lane.b32.xlu0 %v4291_v5, %s2429_s5  ;;  %v4298_v5 = vld [vmem:[#allocation38_spill] sm:$0xff] }
 0x110   : > { %v604_v11 = vpop.permute.xlu1 %603 }
 0x111   : > { %v3410_v15 = vsel %vm1272_vm4, %v1271_v57, %v604_v11  ;;  %v602_v4 = vpop.permute.xlu0 %601  ;;  %v4301_v57 = vld [vmem:[#allocation8_spill] sm:$0xff] }
 0x112   : > { %v3413_v30 = vsel %vm1272_vm4, %v1270_v50, %v602_v4  ;;  %860 = vrot.lane.b32.xlu1 %v4292_v39, %s2430_s10  ;;  %v1240_v11 = vsel %vm1239_vm3, %v4301_v57, %v4300_v44  ;;  %v4302_v50 = vld [vmem:[#allocation37_spill] sm:$0xff]  ;;  %v4304_v44 = vld [vmem:[#allocation56_spill] sm:$0xff] }
 0x113   : > { %1157 = vrot.lane.b32.xlu0 %v4292_v39, %s2433_s29  ;;  %v1273_v4 = vsel %vm1272_vm4, %v1240_v11, %v3193_v63 }
 0x114   : > { %v3419_v18 = vpop.permute.xlu1 %641 }
 0x115   : > { %v640_v52 = vpop.permute.xlu0 %639 }
 0x116   : > { %958 = vrot.lane.b32.xlu1 %v2625_v46, %s2431_s24  ;;  %v4295_v46 = vld [vmem:[#allocation14_spill] sm:$0xff]  ;;  %v1306_v39 = vsel %vm1305_vm5, %v1273_v4, %v640_v52 }
 0x117   : > { %956 = vrot.lane.b32.xlu0 %v2631_v48, %s2431_s24 }
 0x118   : > { %v3425_v8 = vpop.permute.xlu1 %645 }
 0x119   : > { %v3427_v17 = vpop.permute.xlu0 %643 }
 0x11a   : > { %761 = vrot.lane.b32.xlu1 %v4293_v12, %s2429_s5 }
 0x11b   : > { %1058 = vrot.lane.b32.xlu0 %v4293_v12, %s2432_s27 }
 0x11c   : > { %v3433_v41 = vpop.permute.xlu1 %649 }
 0x11d   : > { %v3435_v34 = vpop.permute.xlu0 %647 }
 0x11e   : > { %1159 = vrot.lane.b32.xlu1 %v4294_v31, %s2433_s29 }
 0x11f   : > { %1060 = vrot.lane.b32.xlu0 %v4295_v46, %s2432_s27 }
 0x120   : > { %v3441_v48 = vpop.permute.xlu1 %653 }
 0x121   : > { %v3443_v37 = vpop.permute.xlu0 %651 }
 0x122   : > { %862 = vrot.lane.b32.xlu1 %v4294_v31, %s2430_s10 }
 0x123   : > { %763 = vrot.lane.b32.xlu0 %v4295_v46, %s2429_s5 }
 0x124   : > { %v3449_v7 = vpop.permute.xlu1 %657 }
 0x125   : > { %v3451_v53 = vpop.permute.xlu0 %655 }
 0x126   : > { %864 = vrot.lane.b32.xlu1 %v4296_v60, %s2430_s10 }
 0x127   : > { %1161 = vrot.lane.b32.xlu0 %v4296_v60, %s2433_s29 }
 0x128   : > { %v3457_v59 = vpop.permute.xlu1 %661 }
 0x129   : > { %v3459_v2 = vpop.permute.xlu0 %659 }
 0x12a   : > { %962 = vrot.lane.b32.xlu1 %v2647_v54, %s2431_s24  ;;  %v4299_v54 = vld [vmem:[#allocation16_spill] sm:$0xff] }
 0x12b   : > { %960 = vrot.lane.b32.xlu0 %v2653_v56, %s2431_s24 }
 0x12c   : > { %v3465_v38 = vpop.permute.xlu1 %665 }
 0x12d   : > { %v3467_v40 = vpop.permute.xlu0 %663 }
 0x12e   : > { %765 = vrot.lane.b32.xlu1 %v4297_v26, %s2429_s5 }
 0x12f   : > { %1062 = vrot.lane.b32.xlu0 %v4297_v26, %s2432_s27 }
 0x130   : > { %v744_v42 = vpop.permute.xlu1 %743 }
 0x131   : > { %v742_v58 = vpop.permute.xlu0 %741 }
 0x132   : > { %1163 = vrot.lane.b32.xlu1 %v4298_v5, %s2433_s29  ;;  %v1339_v31 = vsel %vm1338_vm6, %v1306_v39, %v742_v58 }
 0x133   : > { %1064 = vrot.lane.b32.xlu0 %v4299_v54, %s2432_s27 }
 0x134   : > { %v845_v27 = vpop.permute.xlu1 %844 }
 0x135   : > { %v843_v56 = vpop.permute.xlu0 %842 }
 0x136   : > { %866 = vrot.lane.b32.xlu1 %v4298_v5, %s2430_s10  ;;  %v1372_v60 = vsel %vm1371_vm7, %v1339_v31, %v843_v56  ;;  %v2312_v56 = vld [vmem:[%s2510_s28 + $0x8] sm:$0xff] }
 0x137   : > { %767 = vrot.lane.b32.xlu0 %v4299_v54, %s2429_s5  ;;  %v4303_v54 = vld [vmem:[#allocation19_spill] sm:$0xff]  ;;  %v1241_v57 = vsel %vm1239_vm3, %v2312_v56, %v4304_v44 }
 0x138   : > { %v943_v9 = vpop.permute.xlu1 %942 }
 0x139   : > { %v941_v13 = vpop.permute.xlu0 %940 }
 0x13a   : > { %868 = vrot.lane.b32.xlu1 %v4302_v50, %s2430_s10  ;;  %v1405_v63 = vsel %vm1404_vm8, %v1372_v60, %v941_v13 }
 0x13b   : > { %1165 = vrot.lane.b32.xlu0 %v4302_v50, %s2433_s29 }
 0x13c   : > { %v746_v12 = vpop.permute.xlu1 %745 }
 0x13d   : > { %v1043_v46 = vpop.permute.xlu0 %1042 }
 0x13e   : > { %667 = vrot.lane.b32.xlu1 %v2675_v3, %s2428_s4  ;;  %v1438_v52 = vsel %vm1437_vm9, %v1405_v63, %v1043_v46  ;;  %v4305_v63 = vld [vmem:[#allocation40_spill] sm:$0xff] }
 0x13f   : > { %964 = vrot.lane.b32.xlu0 %v2675_v3, %s2431_s24  ;;  %v1274_v3 = vsel %vm1272_vm4, %v1241_v57, %v3191_v28 }
 0x140   : > { %v1144_v26 = vpop.permute.xlu1 %1143  ;;  %v1307_v11 = vsel %vm1305_vm5, %v1274_v3, %v3419_v18 }
 0x141   : > { %v1045_v5 = vpop.permute.xlu0 %1044  ;;  %v1471_v58 = vsel %vm1470_vm10, %v1438_v52, %v1144_v26  ;;  %v1340_v4 = vsel %vm1338_vm6, %v1307_v11, %v744_v42  ;;  %v4306_v42 = vld [vmem:[#allocation18_spill] sm:$0xff]  ;;  %v4309_v11 = vld [vmem:[#allocation39_spill] sm:$0xff] }
 0x142   : > { %1066 = vrot.lane.b32.xlu1 %v4303_v54, %s2432_s27  ;;  %2196 = vmatprep.mubr.msk.f32.mxu0 %vm1508_vm11, %v1471_v58  ;;  %v1373_v39 = vsel %vm1371_vm7, %v1340_v4, %v845_v27  ;;  %v2313_v26 = vld [vmem:[%s2510_s28 + $0x18] sm:$0xff] }
 0x143   : > { %966 = vrot.lane.b32.xlu0 %v2669_v62, %s2431_s24  ;;  %v1406_v31 = vsel %vm1404_vm8, %v1373_v39, %v943_v9 }
 0x144   : > { %v847_v13 = vpop.permute.xlu1 %846  ;;  %v1439_v28 = vsel %vm1437_vm9, %v1406_v31, %v1045_v5  ;;  %v4308_v5 = vld [vmem:[#allocation63_spill] sm:$0xff] }
 0x145   : > { %v748_v50 = vpop.permute.xlu0 %747 }
 0x146   : > { %769 = vrot.lane.b32.xlu1 %v4303_v54, %s2429_s5 }
 0x147   : > { %669 = vrot.lane.b32.xlu0 %v2669_v62, %s2428_s4  ;;  %v4307_v62 = vld [vmem:[#allocation50_spill] sm:$0xff] }
 0x148   : > { %v849_v46 = vpop.permute.xlu1 %848  ;;  %v1242_v9 = vsel %vm1239_vm3, %v2313_v26, %v4307_v62 }
 0x149   : > { %v1146_v60 = vpop.permute.xlu0 %1145  ;;  %v1275_v58 = vsel %vm1272_vm4, %v1242_v9, %v4308_v5  ;;  %v4312_v9 = vld [vmem:[#allocation21_spill] sm:$0xff] }
 0x14a   : > { %v1472_v18 = vsel %vm1470_vm10, %v1439_v28, %v1146_v60  ;;  %1167 = vrot.lane.b32.xlu1 %v4305_v63, %s2433_s29  ;;  %v1308_v54 = vsel %vm1305_vm5, %v1275_v58, %v3427_v17 }
 0x14b   : > { %1068 = vrot.lane.b32.xlu0 %v4306_v42, %s2432_s27  ;;  %2197 = vmatmul.mubr.msk.f32.vlgmr.msra.gmra.mrb[0].mxu0 %vm1508_vm11, %v1472_v18  ;;  %v1341_v44 = vsel %vm1338_vm6, %v1308_v54, %v746_v12  ;;  %v2314_v12 = vld [vmem:[%s2510_s28 + $0x20] sm:$0xff]  ;;  %v4311_v18 = vld [vmem:[#allocation62_spill] sm:$0xff] }
 0x14c   : > { %v947_v27 = vpop.permute.xlu1 %946  ;;  %v1374_v3 = vsel %vm1371_vm7, %v1341_v44, %v847_v13  ;;  %v4310_v13 = vld [vmem:[#allocation54_spill] sm:$0xff] }
 0x14d   : > { %v945_v52 = vpop.permute.xlu0 %944  ;;  %v1243_v60 = vsel %vm1239_vm3, %v2314_v12, %v4310_v13 }
 0x14e   : > { %870 = vrot.lane.b32.xlu1 %v4305_v63, %s2430_s10  ;;  %v1407_v4 = vsel %vm1404_vm8, %v1374_v3, %v945_v52  ;;  %v1276_v63 = vsel %vm1272_vm4, %v1243_v60, %v4311_v18  ;;  %v4313_v3 = vld [vmem:[#allocation60_spill] sm:$0xff] }
 0x14f   : > { %771 = vrot.lane.b32.xlu0 %v4306_v42, %s2429_s5  ;;  %v1309_v52 = vsel %vm1305_vm5, %v1276_v63, %v3425_v8 }
 0x150   : > { %v750_v56 = vpop.permute.xlu1 %749  ;;  %v1342_v62 = vsel %vm1338_vm6, %v1309_v52, %v748_v50 }
 0x151   : > { %v1047_v57 = vpop.permute.xlu0 %1046  ;;  %v1375_v5 = vsel %vm1371_vm7, %v1342_v62, %v849_v46  ;;  %v4318_v62 = vld [vmem:[#allocation58_spill] sm:$0xff] }
 0x152   : > { %872 = vrot.lane.b32.xlu1 %v4309_v11, %s2430_s10  ;;  %v1440_v39 = vsel %vm1437_vm9, %v1407_v4, %v1047_v57  ;;  %v2315_v57 = vld [vmem:[%s2510_s28 + $0x30] sm:$0xff] }
 0x153   : > { %1169 = vrot.lane.b32.xlu0 %v4309_v11, %s2433_s29  ;;  %v4314_v11 = vld [vmem:[#allocation42_spill] sm:$0xff]  ;;  %v4315_v4 = vld [vmem:[#allocation65_spill] sm:$0xff] }
 0x154   : > { %v1148_v31 = vpop.permute.xlu1 %1147 }
 0x155   : > { %v1473_v28 = vsel %vm1470_vm10, %v1440_v39, %v1148_v31  ;;  %v1049_v17 = vpop.permute.xlu0 %1048  ;;  %v4316_v31 = vld [vmem:[#allocation20_spill] sm:$0xff] }
 0x156   : > { %671 = vrot.lane.b32.xlu1 %v2697_v19, %s2428_s4  ;;  %2199 = vmatprep.mubr.msk.f32.mxu0 %vm1508_vm11, %v1473_v28 }
 0x157   : > { %968 = vrot.lane.b32.xlu0 %v2697_v19, %s2431_s24  ;;  %v1408_v19 = vsel %vm1404_vm8, %v1375_v5, %v947_v27  ;;  %v1244_v27 = vsel %vm1239_vm3, %v2315_v57, %v4313_v3  ;;  %v4319_v5 = vld [vmem:[#allocation64_spill] sm:$0xff]  ;;  %v2317_v57 = vld [vmem:[%s2510_s28 + $0xf0] sm:$0xff] }
 0x158   : > { %v851_v42 = vpop.permute.xlu1 %850  ;;  %v1441_v54 = vsel %vm1437_vm9, %v1408_v19, %v1049_v17  ;;  %v1277_v39 = vsel %vm1272_vm4, %v1244_v27, %v4315_v4 }
 0x159   : > { %v752_v26 = vpop.permute.xlu0 %751 }
 0x15a   : > { %1070 = vrot.lane.b32.xlu1 %v4312_v9, %s2432_s27 }
 0x15b   : > { %970 = vrot.lane.b32.xlu0 %v2691_v16, %s2431_s24 }
 0x15c   : > { %v853_v58 = vpop.permute.xlu1 %852 }
 0x15d   : > { %v1150_v44 = vpop.permute.xlu0 %1149 }
 0x15e   : > { %v1474_v8 = vsel %vm1470_vm10, %v1441_v54, %v1150_v44  ;;  %773 = vrot.lane.b32.xlu1 %v4312_v9, %s2429_s5 }
 0x15f   : > { %673 = vrot.lane.b32.xlu0 %v2691_v16, %s2428_s4  ;;  %2200 = vmatmul.mubr.msk.f32.gmra.mrb[2].mxu0 %vm1508_vm11, %v1474_v8  ;;  %v1310_v16 = vsel %vm1305_vm5, %v1277_v39, %v3435_v34 }
 0x160   : > { %v951_v50 = vpop.permute.xlu1 %950  ;;  %v1343_v17 = vsel %vm1338_vm6, %v1310_v16, %v750_v56  ;;  %v4317_v56 = vld [vmem:[#allocation41_spill] sm:$0xff] }
 0x161   : > { %v949_v46 = vpop.permute.xlu0 %948  ;;  %v1376_v13 = vsel %vm1371_vm7, %v1343_v17, %v851_v42  ;;  %v2316_v42 = vld [vmem:[%s2510_s28 + $0x38] sm:$0xff]  ;;  %v2319_v17 = vld [vmem:[%s2510_s28 + $0x48] sm:$0xff] }
 0x162   : > { %1171 = vrot.lane.b32.xlu1 %v4314_v11, %s2433_s29  ;;  %v1409_v60 = vsel %vm1404_vm8, %v1376_v13, %v949_v46  ;;  %v1245_v9 = vsel %vm1239_vm3, %v2316_v42, %v4318_v62  ;;  %v4323_v62 = vld [vmem:[#allocation22_spill] sm:$0xff] }
 0x163   : > { %1072 = vrot.lane.b32.xlu0 %v4316_v31, %s2432_s27  ;;  %v1278_v19 = vsel %vm1272_vm4, %v1245_v9, %v4319_v5 }
 0x164   : > { %v754_v28 = vpop.permute.xlu1 %753  ;;  %v1311_v44 = vsel %vm1305_vm5, %v1278_v19, %v3433_v41  ;;  %v4320_v41 = vld [vmem:[#allocation23_spill] sm:$0xff]  ;;  %v4324_v19 = vld [vmem:[#allocation66_spill] sm:$0xff] }
 0x165   : > { %v1051_v12 = vpop.permute.xlu0 %1050  ;;  %v1344_v46 = vsel %vm1338_vm6, %v1311_v44, %v752_v26  ;;  %v2318_v26 = vld [vmem:[%s2510_s28 + $0xf8] sm:$0xff] }
 0x166   : > { %874 = vrot.lane.b32.xlu1 %v4314_v11, %s2430_s10  ;;  %v1442_v18 = vsel %vm1437_vm9, %v1409_v60, %v1051_v12  ;;  %v1377_v3 = vsel %vm1371_vm7, %v1344_v46, %v853_v58  ;;  %v4321_v12 = vld [vmem:[#allocation61_spill] sm:$0xff] }
 0x167   : > { %775 = vrot.lane.b32.xlu0 %v4316_v31, %s2429_s5  ;;  %v1410_v27 = vsel %vm1404_vm8, %v1377_v3, %v951_v50  ;;  %v1246_v50 = vsel %vm1239_vm3, %v2319_v17, %v4321_v12 }
 0x168   : > { %v1152_v63 = vpop.permute.xlu1 %1151  ;;  %v1279_v13 = vsel %vm1272_vm4, %v1246_v50, %v3221_v24 }
 0x169   : > { %v1475_v34 = vsel %vm1470_vm10, %v1442_v18, %v1152_v63  ;;  %v1053_v52 = vpop.permute.xlu0 %1052  ;;  %v1312_v60 = vsel %vm1305_vm5, %v1279_v13, %v3443_v37 }
 0x16a   : > { %876 = vrot.lane.b32.xlu1 %v4317_v56, %s2430_s10  ;;  %2202 = vmatprep.mubr.msk.f32.mxu0 %vm1508_vm11, %v1475_v34  ;;  %v1443_v4 = vsel %vm1437_vm9, %v1410_v27, %v1053_v52  ;;  %v1345_v63 = vsel %vm1338_vm6, %v1312_v60, %v754_v28 }
 0x16b   : > { %1173 = vrot.lane.b32.xlu0 %v4317_v56, %s2433_s29  ;;  %v4322_v56 = vld [vmem:[#allocation44_spill] sm:$0xff] }
 0x16c   : > { %v855_v54 = vpop.permute.xlu1 %854 }
 0x16d   : > { %v756_v8 = vpop.permute.xlu0 %755  ;;  %v1378_v52 = vsel %vm1371_vm7, %v1345_v63, %v855_v54  ;;  %v1313_v54 = vsel %vm1305_vm5, %v4324_v19, %v3441_v48 }
 0x16e   : > { %675 = vrot.lane.b32.xlu1 %v2317_v57, %s2428_s4  ;;  %v1346_v46 = vsel %vm1338_vm6, %v1313_v54, %v756_v8 }
 0x16f   : > { %972 = vrot.lane.b32.xlu0 %v2317_v57, %s2431_s24  ;;  %v4325_v57 = vld [vmem:[#allocation43_spill] sm:$0xff] }
 0x170   : > { %v857_v11 = vpop.permute.xlu1 %856 }
 0x171   : > { %v1154_v39 = vpop.permute.xlu0 %1153  ;;  %v1379_v3 = vsel %vm1371_vm7, %v1346_v46, %v857_v11  ;;  %v2322_v46 = vld [vmem:[%s2510_s28 + $0x120] sm:$0xff] }
 0x172   : > { %v1476_v31 = vsel %vm1470_vm10, %v1443_v4, %v1154_v39  ;;  %1074 = vrot.lane.b32.xlu1 %v4320_v41, %s2432_s27 }
 0x173   : > { %974 = vrot.lane.b32.xlu0 %v2318_v26, %s2431_s24  ;;  %2203 = vmatmul.mubr.msk.f32.gmra.mrb[4].mxu0 %vm1508_vm11, %v1476_v31 }
 0x174   : > { %v955_v16 = vpop.permute.xlu1 %954 }
 0x175   : > { %v953_v58 = vpop.permute.xlu0 %952  ;;  %v1412_v27 = vsel %vm1404_vm8, %v1379_v3, %v955_v16  ;;  %v1314_v16 = vsel %vm1305_vm5, %v3237_v43, %v3451_v53  ;;  %v4327_v43 = vld [vmem:[#allocation46_spill] sm:$0xff]  ;;  %v4328_v53 = vld [vmem:[#allocation24_spill] sm:$0xff] }
 0x176   : > { %777 = vrot.lane.b32.xlu1 %v4320_v41, %s2429_s5  ;;  %v1411_v42 = vsel %vm1404_vm8, %v1378_v52, %v953_v58  ;;  %v2320_v41 = vld [vmem:[%s2510_s28 + $0x108] sm:$0xff]  ;;  %v2321_v58 = vld [vmem:[%s2510_s28 + $0x110] sm:$0xff] }
 0x177   : > { %677 = vrot.lane.b32.xlu0 %v2318_v26, %s2428_s4  ;;  %v4326_v26 = vld [vmem:[#allocation25_spill] sm:$0xff] }
 0x178   : > { %v758_v18 = vpop.permute.xlu1 %757 }
 0x179   : > { %v1055_v34 = vpop.permute.xlu0 %1054  ;;  %v1347_v12 = vsel %vm1338_vm6, %v1314_v16, %v758_v18 }
 0x17a   : > { %1175 = vrot.lane.b32.xlu1 %v4322_v56, %s2433_s29  ;;  %v1444_v24 = vsel %vm1437_vm9, %v1411_v42, %v1055_v34  ;;  %v1315_v42 = vsel %vm1305_vm5, %v3234_v49, %v3449_v7  ;;  %v4329_v7 = vld [vmem:[#allocation45_spill] sm:$0xff] }
 0x17b   : > { %1076 = vrot.lane.b32.xlu0 %v4323_v62, %s2432_s27 }
 0x17c   : > { %v1156_v9 = vpop.permute.xlu1 %1155 }
 0x17d   : > { %v1477_v5 = vsel %vm1470_vm10, %v1444_v24, %v1156_v9  ;;  %v1057_v37 = vpop.permute.xlu0 %1056 }
 0x17e   : > { %878 = vrot.lane.b32.xlu1 %v4322_v56, %s2430_s10  ;;  %2205 = vmatprep.mubr.msk.f32.mxu0 %vm1508_vm11, %v1477_v5  ;;  %v1445_v39 = vsel %vm1437_vm9, %v1412_v27, %v1057_v37 }
 0x17f   : > { %779 = vrot.lane.b32.xlu0 %v4323_v62, %s2429_s5 }
 0x180   : > { %v859_v28 = vpop.permute.xlu1 %858 }
 0x181   : > { %v760_v44 = vpop.permute.xlu0 %759  ;;  %v1380_v13 = vsel %vm1371_vm7, %v1347_v12, %v859_v28  ;;  %v4331_v12 = vld [vmem:[#allocation48_spill] sm:$0xff] }
 0x182   : > { %880 = vrot.lane.b32.xlu1 %v4325_v57, %s2430_s10  ;;  %v1348_v24 = vsel %vm1338_vm6, %v1315_v42, %v760_v44  ;;  %v2324_v42 = vld [vmem:[%s2510_s28 + $0x138] sm:$0xff] }
 0x183   : > { %1177 = vrot.lane.b32.xlu0 %v4325_v57, %s2433_s29  ;;  %v1316_v57 = vsel %vm1305_vm5, %v3253_v22, %v3459_v2 }
 0x184   : > { %v861_v4 = vpop.permute.xlu1 %860 }
 0x185   : > { %v1158_v31 = vpop.permute.xlu0 %1157  ;;  %v1381_v9 = vsel %vm1371_vm7, %v1348_v24, %v861_v4 }
 0x186   : > { %v1478_v48 = vsel %vm1470_vm10, %v1445_v39, %v1158_v31  ;;  %679 = vrot.lane.b32.xlu1 %v2320_v41, %s2428_s4  ;;  %v4330_v31 = vld [vmem:[#allocation27_spill] sm:$0xff] }
 0x187   : > { %976 = vrot.lane.b32.xlu0 %v2320_v41, %s2431_s24  ;;  %2206 = vmatmul.mubr.msk.f32.gmra.mrb[6].mxu0 %vm1508_vm11, %v1478_v48  ;;  %v2323_v41 = vld [vmem:[%s2510_s28 + $0x128] sm:$0xff] }
 0x188   : > { %v959_v8 = vpop.permute.xlu1 %958 }
 0x189   : > { %v957_v11 = vpop.permute.xlu0 %956  ;;  %v1414_v5 = vsel %vm1404_vm8, %v1381_v9, %v959_v8 }
 0x18a   : > { %1078 = vrot.lane.b32.xlu1 %v4326_v26, %s2432_s27  ;;  %v1413_v60 = vsel %vm1404_vm8, %v1380_v13, %v957_v11  ;;  %v4332_v13 = vld [vmem:[#allocation26_spill] sm:$0xff] }
 0x18b   : > { %978 = vrot.lane.b32.xlu0 %v2321_v58, %s2431_s24 }
 0x18c   : > { %v762_v17 = vpop.permute.xlu1 %761 }
 0x18d   : > { %v1059_v50 = vpop.permute.xlu0 %1058  ;;  %v1349_v27 = vsel %vm1338_vm6, %v1316_v57, %v762_v17 }
 0x18e   : > { %781 = vrot.lane.b32.xlu1 %v4326_v26, %s2429_s5  ;;  %v1446_v63 = vsel %vm1437_vm9, %v1413_v60, %v1059_v50 }
 0x18f   : > { %681 = vrot.lane.b32.xlu0 %v2321_v58, %s2428_s4  ;;  %v1317_v58 = vsel %vm1305_vm5, %v3250_v14, %v3457_v59 }
 0x190   : > { %v1160_v34 = vpop.permute.xlu1 %1159 }
 0x191   : > { %v1479_v52 = vsel %vm1470_vm10, %v1446_v63, %v1160_v34  ;;  %v1061_v56 = vpop.permute.xlu0 %1060 }
 0x192   : > { %1179 = vrot.lane.b32.xlu1 %v4327_v43, %s2433_s29  ;;  %2208 = vmatprep.mubr.msk.f32.mxu0 %vm1508_vm11, %v1479_v52  ;;  %v1447_v28 = vsel %vm1437_vm9, %v1414_v5, %v1061_v56 }
 0x193   : > { %1080 = vrot.lane.b32.xlu0 %v4328_v53, %s2432_s27 }
 0x194   : > { %v863_v18 = vpop.permute.xlu1 %862 }
 0x195   : > { %v764_v62 = vpop.permute.xlu0 %763  ;;  %v1382_v39 = vsel %vm1371_vm7, %v1349_v27, %v863_v18  ;;  %v4335_v27 = vld [vmem:[#allocation51_spill] sm:$0xff] }
 0x196   : > { %882 = vrot.lane.b32.xlu1 %v4327_v43, %s2430_s10  ;;  %v1350_v17 = vsel %vm1338_vm6, %v1317_v58, %v764_v62  ;;  %v4333_v43 = vld [vmem:[#allocation47_spill] sm:$0xff]  ;;  %v1318_v62 = vsel %vm1305_vm5, %v3269_v33, %v3467_v40  ;;  %v2326_v58 = vld [vmem:[%s2510_s28 + $0x150] sm:$0xff] }
 0x197   : > { %783 = vrot.lane.b32.xlu0 %v4328_v53, %s2429_s5 }
 0x198   : > { %v865_v37 = vpop.permute.xlu1 %864 }
 0x199   : > { %v1162_v19 = vpop.permute.xlu0 %1161  ;;  %v1383_v50 = vsel %vm1371_vm7, %v1350_v17, %v865_v37 }
 0x19a   : > { %v1480_v49 = vsel %vm1470_vm10, %v1447_v28, %v1162_v19  ;;  %884 = vrot.lane.b32.xlu1 %v4329_v7, %s2430_s10  ;;  %v4334_v28 = vld [vmem:[#allocation29_spill] sm:$0xff] }
 0x19b   : > { %1181 = vrot.lane.b32.xlu0 %v4329_v7, %s2433_s29  ;;  %2209 = vmatmul.mubr.msk.f32.gmra.mrb[8].mxu0 %vm1508_vm11, %v1480_v49  ;;  %v2325_v49 = vld [vmem:[%s2510_s28 + $0x140] sm:$0xff] }
 0x19c   : > { %v963_v54 = vpop.permute.xlu1 %962 }
 0x19d   : > { %v961_v44 = vpop.permute.xlu0 %960  ;;  %v1416_v60 = vsel %vm1404_vm8, %v1383_v50, %v963_v54 }
 0x19e   : > { %683 = vrot.lane.b32.xlu1 %v2322_v46, %s2428_s4  ;;  %v1415_v48 = vsel %vm1404_vm8, %v1382_v39, %v961_v44  ;;  %v4336_v39 = vld [vmem:[#allocation28_spill] sm:$0xff] }
 0x19f   : > { %980 = vrot.lane.b32.xlu0 %v2322_v46, %s2431_s24  ;;  %v1319_v46 = vsel %vm1305_vm5, %v3266_v20, %v3465_v38 }
 0x1a0   : > { %v766_v3 = vpop.permute.xlu1 %765 }
 0x1a1   : > { %v1063_v4 = vpop.permute.xlu0 %1062  ;;  %v1351_v9 = vsel %vm1338_vm6, %v1318_v62, %v766_v3 }
 0x1a2   : > { %1082 = vrot.lane.b32.xlu1 %v4330_v31, %s2432_s27  ;;  %v1448_v8 = vsel %vm1437_vm9, %v1415_v48, %v1063_v4 }
 0x1a3   : > { %982 = vrot.lane.b32.xlu0 %v2323_v41, %s2431_s24 }
 0x1a4   : > { %v1164_v11 = vpop.permute.xlu1 %1163 }
 0x1a5   : > { %v1481_v26 = vsel %vm1470_vm10, %v1448_v8, %v1164_v11  ;;  %v1065_v22 = vpop.permute.xlu0 %1064 }
 0x1a6   : > { %785 = vrot.lane.b32.xlu1 %v4330_v31, %s2429_s5  ;;  %2211 = vmatprep.mubr.msk.f32.mxu0 %vm1508_vm11, %v1481_v26  ;;  %v1449_v34 = vsel %vm1437_vm9, %v1416_v60, %v1065_v22  ;;  %v4337_v26 = vld [vmem:[#allocation49_spill] sm:$0xff]  ;;  %v4338_v60 = vld [vmem:[#allocation31_spill] sm:$0xff] }
 0x1a7   : > { %685 = vrot.lane.b32.xlu0 %v2323_v41, %s2428_s4 }
 0x1a8   : > { %v867_v2 = vpop.permute.xlu1 %866 }
 0x1a9   : > { %v768_v16 = vpop.permute.xlu0 %767  ;;  %v1384_v37 = vsel %vm1371_vm7, %v1351_v9, %v867_v2 }
 0x1aa   : > { %1183 = vrot.lane.b32.xlu1 %v4331_v12, %s2433_s29  ;;  %v1352_v3 = vsel %vm1338_vm6, %v1319_v46, %v768_v16 }
 0x1ab   : > { %1084 = vrot.lane.b32.xlu0 %v4332_v13, %s2432_s27 }
 0x1ac   : > { %v869_v63 = vpop.permute.xlu1 %868 }
 0x1ad   : > { %v1166_v52 = vpop.permute.xlu0 %1165  ;;  %v1385_v4 = vsel %vm1371_vm7, %v1352_v3, %v869_v63 }
 0x1ae   : > { %v1482_v14 = vsel %vm1470_vm10, %v1449_v34, %v1166_v52  ;;  %886 = vrot.lane.b32.xlu1 %v4331_v12, %s2430_s10  ;;  %v2327_v34 = vld [vmem:[%s2510_s28 + $0x158] sm:$0xff] }
 0x1af   : > { %787 = vrot.lane.b32.xlu0 %v4332_v13, %s2429_s5  ;;  %2212 = vmatmul.mubr.msk.f32.gmra.mrb[10].mxu0 %vm1508_vm11, %v1482_v14 }
 0x1b0   : > { %v668_v59 = vpop.permute.xlu1 %667 }
 0x1b1   : > { %v965_v56 = vpop.permute.xlu0 %964  ;;  %v1320_v16 = vsel %vm1305_vm5, %v3285_v36, %v668_v59 }
 0x1b2   : > { %888 = vrot.lane.b32.xlu1 %v4333_v43, %s2430_s10  ;;  %v1417_v19 = vsel %vm1404_vm8, %v1384_v37, %v965_v56 }
 0x1b3   : > { %1185 = vrot.lane.b32.xlu0 %v4333_v43, %s2433_s29 }
 0x1b4   : > { %v1067_v53 = vpop.permute.xlu1 %1066 }
 0x1b5   : > { %v967_v18 = vpop.permute.xlu0 %966  ;;  %v1450_v7 = vsel %vm1437_vm9, %v1417_v19, %v1067_v53 }
 0x1b6   : > { %687 = vrot.lane.b32.xlu1 %v2324_v42, %s2428_s4  ;;  %v1418_v31 = vsel %vm1404_vm8, %v1385_v4, %v967_v18  ;;  %v4342_v4 = vld [vmem:[#allocation33_spill] sm:$0xff] }
 0x1b7   : > { %984 = vrot.lane.b32.xlu0 %v2324_v42, %s2431_s24  ;;  %v4339_v42 = vld [vmem:[#allocation55_spill] sm:$0xff] }
 0x1b8   : > { %v770_v24 = vpop.permute.xlu1 %769 }
 0x1b9   : > { %v670_v5 = vpop.permute.xlu0 %669  ;;  %v1353_v12 = vsel %vm1338_vm6, %v1320_v16, %v770_v24  ;;  %v4340_v24 = vld [vmem:[#allocation30_spill] sm:$0xff] }
 0x1ba   : > { %1086 = vrot.lane.b32.xlu1 %v4334_v28, %s2432_s27  ;;  %v1321_v43 = vsel %vm1305_vm5, %v3282_v21, %v670_v5 }
 0x1bb   : > { %986 = vrot.lane.b32.xlu0 %v2325_v49, %s2431_s24 }
 0x1bc   : > { %v1168_v54 = vpop.permute.xlu1 %1167 }
 0x1bd   : > { %v1483_v44 = vsel %vm1470_vm10, %v1450_v7, %v1168_v54  ;;  %v1069_v33 = vpop.permute.xlu0 %1068  ;;  %v4341_v7 = vld [vmem:[#allocation53_spill] sm:$0xff] }
 0x1be   : > { %789 = vrot.lane.b32.xlu1 %v4334_v28, %s2429_s5  ;;  %2214 = vmatprep.mubr.msk.f32.mxu0 %vm1508_vm11, %v1483_v44  ;;  %v1451_v41 = vsel %vm1437_vm9, %v1418_v31, %v1069_v33  ;;  %v2328_v33 = vld [vmem:[%s2510_s28 + $0x168] sm:$0xff]  ;;  %v2329_v31 = vld [vmem:[%s2510_s28 + $0x170] sm:$0xff] }
 0x1bf   : > { %689 = vrot.lane.b32.xlu0 %v2325_v49, %s2428_s4 }
 0x1c0   : > { %v871_v40 = vpop.permute.xlu1 %870 }
 0x1c1   : > { %v772_v57 = vpop.permute.xlu0 %771  ;;  %v1386_v13 = vsel %vm1371_vm7, %v1353_v12, %v871_v40 }
 0x1c2   : > { %1187 = vrot.lane.b32.xlu1 %v4335_v27, %s2433_s29  ;;  %v1354_v18 = vsel %vm1338_vm6, %v1321_v43, %v772_v57 }
 0x1c3   : > { %1088 = vrot.lane.b32.xlu0 %v4336_v39, %s2432_s27 }
 0x1c4   : > { %v873_v48 = vpop.permute.xlu1 %872 }
 0x1c5   : > { %v1170_v8 = vpop.permute.xlu0 %1169  ;;  %v1387_v62 = vsel %vm1371_vm7, %v1354_v18, %v873_v48 }
 0x1c6   : > { %v1484_v20 = vsel %vm1470_vm10, %v1451_v41, %v1170_v8  ;;  %890 = vrot.lane.b32.xlu1 %v4335_v27, %s2430_s10 }
 0x1c7   : > { %791 = vrot.lane.b32.xlu0 %v4336_v39, %s2429_s5  ;;  %2215 = vmatmul.mubr.msk.f32.gmra.mrb[12].mxu0 %vm1508_vm11, %v1484_v20 }
 0x1c8   : > { %v672_v38 = vpop.permute.xlu1 %671 }
 0x1c9   : > { %v969_v11 = vpop.permute.xlu0 %968  ;;  %v1322_v40 = vsel %vm1305_vm5, %v3301_v6, %v672_v38 }
 0x1ca   : > { %892 = vrot.lane.b32.xlu1 %v4337_v26, %s2430_s10  ;;  %v1419_v63 = vsel %vm1404_vm8, %v1386_v13, %v969_v11 }
 0x1cb   : > { %1189 = vrot.lane.b32.xlu0 %v4337_v26, %s2433_s29 }
 0x1cc   : > { %v1071_v22 = vpop.permute.xlu1 %1070 }
 0x1cd   : > { %v971_v2 = vpop.permute.xlu0 %970  ;;  %v1452_v52 = vsel %vm1437_vm9, %v1419_v63, %v1071_v22  ;;  %v4343_v22 = vld [vmem:[#allocation59_spill] sm:$0xff]  ;;  %v230_v63 = vld [vmem:[%s2510_s28 + $0x188] sm:$0xff] }
 0x1ce   : > { %691 = vrot.lane.b32.xlu1 %v2326_v58, %s2428_s4  ;;  %v1420_v9 = vsel %vm1404_vm8, %v1387_v62, %v971_v2 }
 0x1cf   : > { %988 = vrot.lane.b32.xlu0 %v2326_v58, %s2431_s24  ;;  %v4344_v58 = vld [vmem:[#allocation32_spill] sm:$0xff] }
 0x1d0   : > { %v774_v17 = vpop.permute.xlu1 %773 }
 0x1d1   : > { %v674_v50 = vpop.permute.xlu0 %673  ;;  %v1355_v57 = vsel %vm1338_vm6, %v1322_v40, %v774_v17 }
 0x1d2   : > { %1090 = vrot.lane.b32.xlu1 %v4338_v60, %s2432_s27  ;;  %v1323_v38 = vsel %vm1305_vm5, %v3298_v23, %v674_v50 }
 0x1d3   : > { %990 = vrot.lane.b32.xlu0 %v2327_v34, %s2431_s24 }
 0x1d4   : > { %v1172_v14 = vpop.permute.xlu1 %1171 }
 0x1d5   : > { %v1485_v56 = vsel %vm1470_vm10, %v1452_v52, %v1172_v14  ;;  %v1073_v36 = vpop.permute.xlu0 %1072  ;;  %v4345_v52 = vld [vmem:[#allocation57_spill] sm:$0xff] }
 0x1d6   : > { %793 = vrot.lane.b32.xlu1 %v4338_v60, %s2429_s5  ;;  %2217 = vmatprep.mubr.msk.f32.mxu0 %vm1508_vm11, %v1485_v56  ;;  %v1453_v28 = vsel %vm1437_vm9, %v1420_v9, %v1073_v36  ;;  %v229_v60 = vld [vmem:[%s2510_s28 + $0x180] sm:$0xff]  ;;  %v737_v56 = vrot.slane %v230_v63, 1 }
 0x1d7   : > { %693 = vrot.lane.b32.xlu0 %v2327_v34, %s2428_s4  ;;  %v736_v14 = vrot.slane %v229_v60, 1 }
 0x1d8   : > { %v875_v59 = vpop.permute.xlu1 %874 }
 0x1d9   : > { %v776_v53 = vpop.permute.xlu0 %775  ;;  %v1388_v27 = vsel %vm1371_vm7, %v1355_v57, %v875_v59  ;;  %v738_v43 = vsel %vm283_vm0, %v736_v14, %v737_v56 }
 0x1da   : > { %1191 = vrot.lane.b32.xlu1 %v4339_v42, %s2433_s29  ;;  %v1356_v26 = vsel %vm1338_vm6, %v1323_v38, %v776_v53 }
 0x1db   : > { %1092 = vrot.lane.b32.xlu0 %v4340_v24, %s2432_s27 }
 0x1dc   : > { %v877_v37 = vpop.permute.xlu1 %876 }
 0x1dd   : > { %v1174_v19 = vpop.permute.xlu0 %1173  ;;  %v1389_v2 = vsel %vm1371_vm7, %v1356_v26, %v877_v37 }
 0x1de   : > { %v1486_v21 = vsel %vm1470_vm10, %v1453_v28, %v1174_v19  ;;  %894 = vrot.lane.b32.xlu1 %v4339_v42, %s2430_s10  ;;  %v837_v28 = vrot.slane %v229_v60, 2  ;;  %v838_v19 = vrot.slane %v230_v63, 2 }
 0x1df   : > { %795 = vrot.lane.b32.xlu0 %v4340_v24, %s2429_s5  ;;  %2218 = vmatmul.mubr.msk.f32.gmra.mrb[14].mxu0 %vm1508_vm11, %v1486_v21  ;;  %v231_v24 = vld [vmem:[%s2510_s28 + $0x190] sm:$0x3] }
 0x1e0   : > { %v676_v5 = vpop.permute.xlu1 %675 }
 0x1e1   : > { %v973_v49 = vpop.permute.xlu0 %972  ;;  %v1324_v53 = vsel %vm1305_vm5, %v3317_v45, %v676_v5  ;;  %v739_v45 = vrot.slane %v231_v24, 1 }
 0x1e2   : > { %896 = vrot.lane.b32.xlu1 %v4341_v7, %s2430_s10  ;;  %v1421_v39 = vsel %vm1404_vm8, %v1388_v27, %v973_v49 }
 0x1e3   : > { %1193 = vrot.lane.b32.xlu0 %v4341_v7, %s2433_s29 }
 0x1e4   : > { %v1075_v54 = vpop.permute.xlu1 %1074 }
 0x1e5   : > { %v975_v44 = vpop.permute.xlu0 %974  ;;  %v1454_v48 = vsel %vm1437_vm9, %v1421_v39, %v1075_v54  ;;  %v839_v54 = vsel %vm460_vm1, %v837_v28, %v838_v19 }
 0x1e6   : > { %695 = vrot.lane.b32.xlu1 %v2328_v33, %s2428_s4  ;;  %v1422_v16 = vsel %vm1404_vm8, %v1389_v2, %v975_v44 }
 0x1e7   : > { %992 = vrot.lane.b32.xlu0 %v2328_v33, %s2431_s24  ;;  %v740_v33 = vsel %vm283_vm0, %v737_v56, %v739_v45 }
 0x1e8   : > { %v778_v46 = vpop.permute.xlu1 %777 }
 0x1e9   : > { %v3818_v3 = vpop.permute.xlu0 %677  ;;  %v1357_v42 = vsel %vm1338_vm6, %v1324_v53, %v778_v46 }
 0x1ea   : > { %1094 = vrot.lane.b32.xlu1 %v4342_v4, %s2432_s27  ;;  %v1325_v40 = vsel %vm1305_vm5, %v3314_v0, %v3818_v3 }
 0x1eb   : > { %994 = vrot.lane.b32.xlu0 %v2329_v31, %s2431_s24 }
 0x1ec   : > { %v1176_v41 = vpop.permute.xlu1 %1175 }
 0x1ed   : > { %v1077_v8 = vpop.permute.xlu0 %1076  ;;  %v1487_v6 = vsel %vm1470_vm10, %v1454_v48, %v1176_v41 }
 0x1ee   : > { %797 = vrot.lane.b32.xlu1 %v4342_v4, %s2429_s5  ;;  %2220 = vmatprep.mubr.msk.f32.mxu1 %vm1508_vm11, %v1487_v6  ;;  %v1455_v12 = vsel %vm1437_vm9, %v1422_v16, %v1077_v8  ;;  %v840_v4 = vrot.slane %v231_v24, 2  ;;  %v233_v6 = vld [vmem:[%s2510_s28 + $0x1a0] sm:$0xff] }
 0x1ef   : > { %697 = vrot.lane.b32.xlu0 %v2329_v31, %s2428_s4  ;;  %v1038_v26 = vrot.slane %v233_v6, 1 }
 0x1f0   : > { %v879_v20 = vpop.permute.xlu1 %878  ;;  %v841_v41 = vsel %vm460_vm1, %v838_v19, %v840_v4 }
 0x1f1   : > { %v780_v11 = vpop.permute.xlu0 %779  ;;  %v1390_v9 = vsel %vm1371_vm7, %v1357_v42, %v879_v20  ;;  %v234_v20 = vld [vmem:[%s2510_s28 + $0x1a8] sm:$0x3] }
 0x1f2   : > { %1195 = vrot.lane.b32.xlu1 %v4343_v22, %s2433_s29  ;;  %v1358_v57 = vsel %vm1338_vm6, %v1325_v40, %v780_v11  ;;  %v232_v11 = vld [vmem:[%s2510_s28 + $0x198] sm:$0xff] }
 0x1f3   : > { %1096 = vrot.lane.b32.xlu0 %v4344_v58, %s2432_s27 }
 0x1f4   : > { %v881_v17 = vpop.permute.xlu1 %880 }
 0x1f5   : > { %v1178_v13 = vpop.permute.xlu0 %1177  ;;  %v1391_v27 = vsel %vm1371_vm7, %v1358_v57, %v881_v17  ;;  %v1139_v17 = vrot.slane %v233_v6, 2 }
 0x1f6   : > { %v1488_v23 = vsel %vm1470_vm10, %v1455_v12, %v1178_v13  ;;  %898 = vrot.lane.b32.xlu1 %v4343_v22, %s2430_s10  ;;  %v1040_v22 = vrot.slane %v234_v20, 1  ;;  %v1141_v13 = vrot.slane %v234_v20, 2 }
 0x1f7   : > { %799 = vrot.lane.b32.xlu0 %v4344_v58, %s2429_s5  ;;  %2221 = vmatmul.mubr.msk.f32.vlgmr.msra.gmra.mrb[0].mxu1 %vm1508_vm11, %v1488_v23  ;;  %v1037_v58 = vrot.slane %v232_v11, 1 }
 0x1f8   : > { %v3848_v50 = vpop.permute.xlu1 %679  ;;  %v1041_v12 = vsel %vm283_vm0, %v1038_v26, %v1040_v22 }
 0x1f9   : > { %v977_v34 = vpop.permute.xlu0 %976  ;;  %v1326_v23 = vsel %vm1305_vm5, %v3333_v10, %v3848_v50 }
 0x1fa   : > { %900 = vrot.lane.b32.xlu1 %v4345_v52, %s2430_s10  ;;  %v1423_v37 = vsel %vm1404_vm8, %v1390_v9, %v977_v34  ;;  %v1039_v34 = vsel %vm283_vm0, %v1037_v58, %v1038_v26 }
 0x1fb   : > { %1197 = vrot.lane.b32.xlu0 %v4345_v52, %s2433_s29 }
 0x1fc   : > { %v1079_v36 = vpop.permute.xlu1 %1078 }
 0x1fd   : > { %v979_v59 = vpop.permute.xlu0 %978  ;;  %v1456_v21 = vsel %vm1437_vm9, %v1423_v37, %v1079_v36 }
 0x1fe   : > { %699 = vrot.lane.b32.xlu1 %v229_v60, %s2428_s4  ;;  %v1424_v39 = vsel %vm1404_vm8, %v1391_v27, %v979_v59  ;;  %v1142_v59 = vsel %vm460_vm1, %v1139_v17, %v1141_v13 }
 0x1ff   : > { %996 = vrot.lane.b32.xlu0 %v229_v60, %s2431_s24  ;;  %v1138_v60 = vrot.slane %v232_v11, 2 }
 0x200   : > { %v782_v18 = vpop.permute.xlu1 %781 }
 0x201   : > { %v3862_v62 = vpop.permute.xlu0 %681  ;;  %v1359_v52 = vsel %vm1338_vm6, %v1326_v23, %v782_v18 }
 0x202   : > { %1098 = vrot.lane.b32.xlu1 %v738_v43, %s2432_s27 }
 0x203   : > { %998 = vrot.lane.b32.xlu0 %v230_v63, %s2431_s24 }
 0x204   : > { %v1180_v49 = vpop.permute.xlu1 %1179 }
 0x205   : > { %v1489_v5 = vsel %vm1470_vm10, %v1456_v21, %v1180_v49  ;;  %v1081_v7 = vpop.permute.xlu0 %1080  ;;  %v1327_v21 = vsel %vm1305_vm5, %v3330_v32, %v3862_v62 }
 0x206   : > { %801 = vrot.lane.b32.xlu1 %v738_v43, %s2429_s5  ;;  %2223 = vmatprep.mubr.msk.f32.mxu1 %vm1508_vm11, %v1489_v5  ;;  %v1457_v48 = vsel %vm1437_vm9, %v1424_v39, %v1081_v7  ;;  %v1140_v43 = vsel %vm460_vm1, %v1138_v60, %v1139_v17 }
 0x207   : > { %701 = vrot.lane.b32.xlu0 %v230_v63, %s2428_s4  ;;  %s3901_s4 = sand.u32 1, %s2416_s13  }
 0x208   : > { %v883_v44 = vpop.permute.xlu1 %882  ;;  %s2105_s28 = sshll.u32 %s3901_s4, 8  ;;  %s1976_s11 = scalar_lea.sflag [#allocation3], %s3901_s4 }
 0x209   : > { %v3879_v46 = vpop.permute.xlu0 %783  ;;  %v1392_v56 = vsel %vm1371_vm7, %v1359_v52, %v883_v44 }
 0x20a   : > { %1199 = vrot.lane.b32.xlu1 %v839_v54, %s2433_s29  ;;  %v1360_v45 = vsel %vm1338_vm6, %v1327_v21, %v3879_v46 }
 0x20b   : > { %1100 = vrot.lane.b32.xlu0 %v740_v33, %s2432_s27 }
 0x20c   : > { %v885_v31 = vpop.permute.xlu1 %884 }
 0x20d   : > { %v1182_v0 = vpop.permute.xlu0 %1181  ;;  %v1393_v7 = vsel %vm1371_vm7, %v1360_v45, %v885_v31 }
 0x20e   : > { %v1490_v3 = vsel %vm1470_vm10, %v1457_v48, %v1182_v0  ;;  %902 = vrot.lane.b32.xlu1 %v839_v54, %s2430_s10 }
 0x20f   : > { %803 = vrot.lane.b32.xlu0 %v740_v33, %s2429_s5  ;;  %2224 = vmatmul.mubr.msk.f32.gmra.mrb[2].mxu1 %vm1508_vm11, %v1490_v3  ;;  %s3921_s5 = scalar_lea.vmem [#allocation2], %s2105_s28 }
 0x210   : > { %v3892_v8 = vpop.permute.xlu1 %683  ;;  %s1994_s7 = sshll.u32 %s3921_s5, 4  ;;  %s4052_s7 = int_to_ptr.vmem [resolvable:$true] %s1994_s7 }
 0x211   : > { %v981_v38 = vpop.permute.xlu0 %980  ;;  %v1328_v46 = vsel %vm1305_vm5, %v3349_v51, %v3892_v8  ;;  %s2330_s17 = scalar_lea.vmem %s4052_s7, 4096  ;;  %p2337_p0 = scmp.lt.s32.totalorder %s4052_s7, %s2335_s20 }
 0x212   : > { %904 = vrot.lane.b32.xlu1 %v841_v41, %s2430_s10  ;;  %v1425_v36 = vsel %vm1404_vm8, %v1392_v56, %v981_v38  ;;  %s4050_s10 = scalar_lea.hbm %s4131_s2, %s2148_s6  ;;  %p2331_p11 = scmp.ne.s32.totalorder %s4052_s7, %s2330_s17 }
 0x213   : > { %1201 = vrot.lane.b32.xlu0 %v841_v41, %s2433_s29 }
 0x214   : > { %v1083_v2 = vpop.permute.xlu1 %1082  ;;  %p2332_p12 = pnand %p2331_p11, %p2495_p5 }
 0x215   : > { %v983_v16 = vpop.permute.xlu0 %982  ;;  %v1458_v10 = vsel %vm1437_vm9, %v1425_v36, %v1083_v2 }
 0x216   : > { %1002 = vrot.lane.b32.xlu1 %v233_v6, %s2431_s24  ;;  %v1426_v54 = vsel %vm1404_vm8, %v1393_v7, %v983_v16  ;;  %p2333_p13 = pneg %p2332_p12 }
 0x217   : > { %1000 = vrot.lane.b32.xlu0 %v232_v11, %s2431_s24  ;;  %s2336_s24 = scalar_lea.vmem %s2335_s20, 8192 }
 0x218   : > { %v786_v63 = vpop.permute.xlu1 %785  ;;  %p2338_p1 = scmp.lt.s32.totalorder %s2336_s24, %s2330_s17 }
 0x219   : > { %v686_v14 = vpop.permute.xlu0 %685  ;;  %v1361_v31 = vsel %vm1338_vm6, %v1328_v46, %v786_v63 }
 0x21a   : > { %1104 = vrot.lane.b32.xlu1 %v1041_v12, %s2432_s27  ;;  %v1329_v12 = vsel %vm1305_vm5, %v3346_v29, %v686_v14  ;;  %p2339_p2 = por %p2338_p1, %p2337_p0 }
 0x21b   : > { %1102 = vrot.lane.b32.xlu0 %v1039_v34, %s2432_s27 }
 0x21c   : > { %v1184_v50 = vpop.permute.xlu1 %1183  ;;  %p2340_p3 = pnand %p2339_p2, %p2333_p13 }
 0x21d   : > { %v1491_v53 = vsel %vm1470_vm10, %v1458_v10, %v1184_v50  ;;  %v1085_v18 = vpop.permute.xlu0 %1084 }
 0x21e   : > { %v2198_v42 = vpop.f32.mrb[0].mxu0  ;;  %1205 = vrot.lane.b32.xlu1 %v1142_v59, %s2433_s29  ;;  %2226 = vmatprep.mubr.msk.f32.mxu1 %vm1508_vm11, %v1491_v53  ;;  %v1459_v33 = vsel %vm1437_vm9, %v1426_v54, %v1085_v18 }
 0x21f   : > { %1835 = vst [vmem:[%s3921_s5 + $0x8] sm:$0xff] %v2198_v42  ;;  %v1904_v24 = vmul.f32 %v2198_v42, %v2198_v42  ;;  %v1675_v9 = vpop.f32.mrb[1].mxu0  ;;  %1203 = vrot.lane.b32.xlu0 %v1140_v43, %s2433_s29 }
 0x220   : > { %1834 = vst [vmem:[%s3921_s5] sm:$0xff] %v1675_v9  ;;  %v1866_v37 = vadd.f32 %v2198_v42, %v1675_v9  ;;  %v1903_v28 = vmul.f32 %v1675_v9, %v1675_v9  ;;  %v887_v19 = vpop.permute.xlu1 %886 }
 0x221   : > { %v788_v49 = vpop.permute.xlu0 %787  ;;  %v1394_v0 = vsel %vm1371_vm7, %v1361_v31, %v887_v19 }
 0x222   : > { %v1935_v5 = vadd.f32 %v1904_v24, %v1903_v28  ;;  %v1362_v23 = vsel %vm1338_vm6, %v1329_v12, %v788_v49 }
 0x224   : > { %v889_v44 = vpop.permute.xlu1 %888 }
 0x225   : > { %v1186_v40 = vpop.permute.xlu0 %1185  ;;  %v1395_v60 = vsel %vm1371_vm7, %v1362_v23, %v889_v44 }
 0x226   : > { %v1492_v57 = vsel %vm1470_vm10, %v1459_v33, %v1186_v40 }
 0x227   : > { %2227 = vmatmul.mubr.msk.f32.gmra.mrb[4].mxu1 %vm1508_vm11, %v1492_v57 }
 0x228   : > { %v688_v32 = vpop.permute.xlu1 %687 }
 0x229   : > { %v985_v62 = vpop.permute.xlu0 %984  ;;  %v1330_v53 = vsel %vm1305_vm5, %v3365_v25, %v688_v32 }
 0x22a   : > { %v1427_v41 = vsel %vm1404_vm8, %v1394_v0, %v985_v62 }
 0x22c   : > { %v1087_v27 = vpop.permute.xlu1 %1086 }
 0x22d   : > { %v987_v4 = vpop.permute.xlu0 %986  ;;  %v1460_v20 = vsel %vm1437_vm9, %v1427_v41, %v1087_v27 }
 0x22e   : > { %v1428_v63 = vsel %vm1404_vm8, %v1395_v60, %v987_v4 }
 0x230   : > { %v790_v39 = vpop.permute.xlu1 %789 }
 0x231   : > { %v690_v48 = vpop.permute.xlu0 %689  ;;  %v1363_v9 = vsel %vm1338_vm6, %v1330_v53, %v790_v39 }
 0x232   : > { %v2201_v3 = vpop.f32.mrb[2].mxu0  ;;  %v1331_v40 = vsel %vm1305_vm5, %v3362_v55, %v690_v48 }
 0x233   : > { %1837 = vst [vmem:[%s3921_s5 + $0x18] sm:$0xff] %v2201_v3  ;;  %v1685_v6 = vpop.f32.mrb[3].mxu0  ;;  %v1906_v8 = vmul.f32 %v2201_v3, %v2201_v3 }
 0x234   : > { %1836 = vst [vmem:[%s3921_s5 + $0x10] sm:$0xff] %v1685_v6  ;;  %v1867_v38 = vadd.f32 %v1866_v37, %v1685_v6  ;;  %v1905_v11 = vmul.f32 %v1685_v6, %v1685_v6  ;;  %v1188_v26 = vpop.permute.xlu1 %1187 }
 0x235   : > { %v1493_v22 = vsel %vm1470_vm10, %v1460_v20, %v1188_v26  ;;  %v1089_v51 = vpop.permute.xlu0 %1088 }
 0x236   : > { %v1936_v2 = vadd.f32 %v1935_v5, %v1905_v11  ;;  %2229 = vmatprep.mubr.msk.f32.mxu1 %vm1508_vm11, %v1493_v22  ;;  %v1868_v58 = vadd.f32 %v2201_v3, %v1867_v38  ;;  %v1461_v52 = vsel %vm1437_vm9, %v1428_v63, %v1089_v51 }
 0x238   : > { %v891_v16 = vpop.permute.xlu1 %890  ;;  %v1937_v17 = vadd.f32 %v1936_v2, %v1906_v8 }
 0x239   : > { %v792_v13 = vpop.permute.xlu0 %791  ;;  %v1396_v28 = vsel %vm1371_vm7, %v1363_v9, %v891_v16 }
 0x23a   : > { %v1364_v32 = vsel %vm1338_vm6, %v1331_v40, %v792_v13 }
 0x23c   : > { %v893_v34 = vpop.permute.xlu1 %892 }
 0x23d   : > { %v1190_v56 = vpop.permute.xlu0 %1189  ;;  %v1397_v62 = vsel %vm1371_vm7, %v1364_v32, %v893_v34 }
 0x23e   : > { %v1494_v36 = vsel %vm1470_vm10, %v1461_v52, %v1190_v56 }
 0x23f   : > { %2230 = vmatmul.mubr.msk.f32.gmra.mrb[6].mxu1 %vm1508_vm11, %v1494_v36 }
 0x240   : > { %v692_v59 = vpop.permute.xlu1 %691 }
 0x241   : > { %v989_v10 = vpop.permute.xlu0 %988  ;;  %v1332_v51 = vsel %vm1305_vm5, %v3381_v61, %v692_v59 }
 0x242   : > { %v1429_v45 = vsel %vm1404_vm8, %v1396_v28, %v989_v10 }
 0x244   : > { %v1091_v50 = vpop.permute.xlu1 %1090 }
 0x245   : > { %v991_v29 = vpop.permute.xlu0 %990  ;;  %v1462_v5 = vsel %vm1437_vm9, %v1429_v45, %v1091_v50 }
 0x246   : > { %v2204_v14 = vpop.f32.mrb[4].mxu0  ;;  %v1430_v27 = vsel %vm1404_vm8, %v1397_v62, %v991_v29 }
 0x247   : > { %1839 = vst [vmem:[%s3921_s5 + $0x28] sm:$0xff] %v2204_v14  ;;  %v1695_v43 = vpop.f32.mrb[5].mxu0  ;;  %v1908_v19 = vmul.f32 %v2204_v14, %v2204_v14 }
 0x248   : > { %1838 = vst [vmem:[%s3921_s5 + $0x20] sm:$0xff] %v1695_v43  ;;  %v1869_v18 = vadd.f32 %v1868_v58, %v1695_v43  ;;  %v1907_v42 = vmul.f32 %v1695_v43, %v1695_v43  ;;  %v794_v24 = vpop.permute.xlu1 %793 }
 0x249   : > { %v694_v37 = vpop.permute.xlu0 %693  ;;  %v1365_v58 = vsel %vm1338_vm6, %v1332_v51, %v794_v24 }
 0x24a   : > { %v1938_v21 = vadd.f32 %v1937_v17, %v1907_v42  ;;  %v1870_v49 = vadd.f32 %v2204_v14, %v1869_v18  ;;  %v1333_v34 = vsel %vm1305_vm5, %v3378_v47, %v694_v37 }
 0x24c   : > { %v1192_v7 = vpop.permute.xlu1 %1191  ;;  %v1939_v54 = vadd.f32 %v1938_v21, %v1908_v19 }
 0x24d   : > { %v1495_v25 = vsel %vm1470_vm10, %v1462_v5, %v1192_v7  ;;  %v1093_v44 = vpop.permute.xlu0 %1092 }
 0x24e   : > { %2232 = vmatprep.mubr.msk.f32.mxu1 %vm1508_vm11, %v1495_v25  ;;  %v1463_v46 = vsel %vm1437_vm9, %v1430_v27, %v1093_v44 }
 0x250   : > { %v895_v33 = vpop.permute.xlu1 %894 }
 0x251   : > { %v796_v57 = vpop.permute.xlu0 %795  ;;  %v1398_v17 = vsel %vm1371_vm7, %v1365_v58, %v895_v33 }
 0x252   : > { %v1366_v56 = vsel %vm1338_vm6, %v1333_v34, %v796_v57 }
 0x254   : > { %v897_v4 = vpop.permute.xlu1 %896 }
 0x255   : > { %v1194_v39 = vpop.permute.xlu0 %1193  ;;  %v1399_v36 = vsel %vm1371_vm7, %v1366_v56, %v897_v4 }
 0x256   : > { %v1496_v31 = vsel %vm1470_vm10, %v1463_v46, %v1194_v39 }
 0x257   : > { %2233 = vmatmul.mubr.msk.f32.gmra.mrb[8].mxu1 %vm1508_vm11, %v1496_v31 }
 0x258   : > { %v696_v0 = vpop.permute.xlu1 %695 }
 0x259   : > { %v993_v3 = vpop.permute.xlu0 %992  ;;  %v1334_v45 = vsel %vm1305_vm5, %v3397_v1, %v696_v0 }
 0x25a   : > { %v2207_v41 = vpop.f32.mrb[6].mxu0  ;;  %v1431_v12 = vsel %vm1404_vm8, %v1398_v17, %v993_v3 }
 0x25b   : > { %1841 = vst [vmem:[%s3921_s5 + $0x38] sm:$0xff] %v2207_v41  ;;  %v1705_v55 = vpop.f32.mrb[7].mxu0  ;;  %v1910_v11 = vmul.f32 %v2207_v41, %v2207_v41 }
 0x25c   : > { %1840 = vst [vmem:[%s3921_s5 + $0x30] sm:$0xff] %v1705_v55  ;;  %v1871_v48 = vadd.f32 %v1870_v49, %v1705_v55  ;;  %v1909_v6 = vmul.f32 %v1705_v55, %v1705_v55  ;;  %v1095_v20 = vpop.permute.xlu1 %1094 }
 0x25d   : > { %v995_v38 = vpop.permute.xlu0 %994  ;;  %v1464_v13 = vsel %vm1437_vm9, %v1431_v12, %v1095_v20 }
 0x25e   : > { %v1940_v26 = vadd.f32 %v1939_v54, %v1909_v6  ;;  %v1872_v22 = vadd.f32 %v2207_v41, %v1871_v48  ;;  %v1432_v59 = vsel %vm1404_vm8, %v1399_v36, %v995_v38 }
 0x260   : > { %v798_v8 = vpop.permute.xlu1 %797  ;;  %v1941_v2 = vadd.f32 %v1940_v26, %v1910_v11 }
 0x261   : > { %v698_v16 = vpop.permute.xlu0 %697  ;;  %v1367_v7 = vsel %vm1338_vm6, %v1334_v45, %v798_v8 }
 0x262   : > { %v1335_v1 = vsel %vm1305_vm5, %v3394_v35, %v698_v16 }
 0x264   : > { %v1196_v23 = vpop.permute.xlu1 %1195 }
 0x265   : > { %v1497_v60 = vsel %vm1470_vm10, %v1464_v13, %v1196_v23  ;;  %v1097_v63 = vpop.permute.xlu0 %1096 }
 0x266   : > { %2235 = vmatprep.mubr.msk.f32.mxu1 %vm1508_vm11, %v1497_v60  ;;  %v1465_v50 = vsel %vm1437_vm9, %v1432_v59, %v1097_v63 }
 0x268   : > { %v899_v61 = vpop.permute.xlu1 %898 }
 0x269   : > { %v800_v52 = vpop.permute.xlu0 %799  ;;  %v1400_v25 = vsel %vm1371_vm7, %v1367_v7, %v899_v61 }
 0x26a   : > { %v1368_v4 = vsel %vm1338_vm6, %v1335_v1, %v800_v52 }
 0x26c   : > { %v901_v10 = vpop.permute.xlu1 %900 }
 0x26d   : > { %v1198_v29 = vpop.permute.xlu0 %1197  ;;  %v1401_v39 = vsel %vm1371_vm7, %v1368_v4, %v901_v10 }
 0x26e   : > { %v1498_v14 = vsel %vm1470_vm10, %v1465_v50, %v1198_v29  ;;  %v2210_v43 = vpop.f32.mrb[8].mxu0 }
 0x26f   : > { %1843 = vst [vmem:[%s3921_s5 + $0x48] sm:$0xff] %v2210_v43  ;;  %v1715_v53 = vpop.f32.mrb[9].mxu0  ;;  %2236 = vmatmul.mubr.msk.f32.gmra.mrb[10].mxu1 %vm1508_vm11, %v1498_v14  ;;  %v1912_v9 = vmul.f32 %v2210_v43, %v2210_v43 }
 0x270   : > { %1842 = vst [vmem:[%s3921_s5 + $0x40] sm:$0xff] %v1715_v53  ;;  %v1873_v47 = vadd.f32 %v1872_v22, %v1715_v53  ;;  %v1911_v18 = vmul.f32 %v1715_v53, %v1715_v53  ;;  %v700_v42 = vpop.permute.xlu1 %699 }
 0x271   : > { %v997_v24 = vpop.permute.xlu0 %996  ;;  %v1336_v58 = vsel %vm1305_vm5, %v3413_v30, %v700_v42 }
 0x272   : > { %v1942_v37 = vadd.f32 %v1941_v2, %v1911_v18  ;;  %v1874_v28 = vadd.f32 %v2210_v43, %v1873_v47  ;;  %v1433_v44 = vsel %vm1404_vm8, %v1400_v25, %v997_v24 }
 0x274   : > { %v1099_v19 = vpop.permute.xlu1 %1098  ;;  %v1943_v21 = vadd.f32 %v1942_v37, %v1912_v9 }
 0x275   : > { %v999_v49 = vpop.permute.xlu0 %998  ;;  %v1466_v33 = vsel %vm1437_vm9, %v1433_v44, %v1099_v19 }
 0x276   : > { %v1434_v0 = vsel %vm1404_vm8, %v1401_v39, %v999_v49 }
 0x278   : > { %v802_v5 = vpop.permute.xlu1 %801 }
 0x279   : > { %v702_v54 = vpop.permute.xlu0 %701  ;;  %v1369_v12 = vsel %vm1338_vm6, %v1336_v58, %v802_v5 }
 0x27a   : > { %v1337_v8 = vsel %vm1305_vm5, %v3410_v15, %v702_v54 }
 0x27c   : > { %v1200_v40 = vpop.permute.xlu1 %1199 }
 0x27d   : > { %v1499_v57 = vsel %vm1470_vm10, %v1466_v33, %v1200_v40  ;;  %v1101_v32 = vpop.permute.xlu0 %1100 }
 0x27e   : > { %2238 = vmatprep.mubr.msk.f32.mxu1 %vm1508_vm11, %v1499_v57  ;;  %v1467_v48 = vsel %vm1437_vm9, %v1434_v0, %v1101_v32 }
 0x280   : > { %v903_v62 = vpop.permute.xlu1 %902 }
 0x281   : > { %v804_v27 = vpop.permute.xlu0 %803  ;;  %v1402_v23 = vsel %vm1371_vm7, %v1369_v12, %v903_v62 }
 0x282   : > { %v2213_v46 = vpop.f32.mrb[10].mxu0  ;;  %v1370_v16 = vsel %vm1338_vm6, %v1337_v8, %v804_v27 }
 0x283   : > { %1845 = vst [vmem:[%s3921_s5 + $0x58] sm:$0xff] %v2213_v46  ;;  %v1725_v31 = vpop.f32.mrb[11].mxu0  ;;  %v1914_v20 = vmul.f32 %v2213_v46, %v2213_v46 }
 0x284   : > { %1844 = vst [vmem:[%s3921_s5 + $0x50] sm:$0xff] %v1725_v31  ;;  %v1875_v3 = vadd.f32 %v1874_v28, %v1725_v31  ;;  %v1913_v41 = vmul.f32 %v1725_v31, %v1725_v31  ;;  %v905_v55 = vpop.permute.xlu1 %904 }
 0x285   : > { %v1202_v6 = vpop.permute.xlu0 %1201  ;;  %v1403_v13 = vsel %vm1371_vm7, %v1370_v16, %v905_v55 }
 0x286   : > { %v1944_v38 = vadd.f32 %v1943_v21, %v1913_v41  ;;  %v1500_v35 = vsel %vm1470_vm10, %v1467_v48, %v1202_v6  ;;  %v1876_v11 = vadd.f32 %v2213_v46, %v1875_v3 }
 0x287   : > { %2239 = vmatmul.mubr.msk.f32.gmra.mrb[12].mxu1 %vm1508_vm11, %v1500_v35 }
 0x288   : > { %v1003_v26 = vpop.permute.xlu1 %1002  ;;  %v1945_v22 = vadd.f32 %v1944_v38, %v1914_v20 }
 0x289   : > { %v1001_v51 = vpop.permute.xlu0 %1000  ;;  %v1436_v60 = vsel %vm1404_vm8, %v1403_v13, %v1003_v26 }
 0x28a   : > { %v1435_v63 = vsel %vm1404_vm8, %v1402_v23, %v1001_v51 }
 0x28c   : > { %v1105_v2 = vpop.permute.xlu1 %1104 }
 0x28d   : > { %v1103_v17 = vpop.permute.xlu0 %1102  ;;  %v1469_v15 = vsel %vm1437_vm9, %v1436_v60, %v1105_v2 }
 0x28e   : > { %v1468_v30 = vsel %vm1437_vm9, %v1435_v63, %v1103_v17 }
 0x290   : > { %v1206_v61 = vpop.permute.xlu1 %1205 }
 0x291   : > { %v1502_v34 = vsel %vm1470_vm10, %v1469_v15, %v1206_v61  ;;  %v1204_v52 = vpop.permute.xlu0 %1203 }
 0x292   : > { %v1501_v56 = vsel %vm1470_vm10, %v1468_v30, %v1204_v52 }
 0x293   : > { %2241 = vmatprep.mubr.msk.f32.mxu1 %vm1508_vm11, %v1501_v56 }
 0x294   : > { %2242 = vmatmul.mubr.msk.f32.gmra.mrb[14].mxu1 %vm1508_vm11, %v1502_v34 }
 0x29a   : > { %v2216_v36 = vpop.f32.mrb[12].mxu0 }
 0x29b   : > { %1847 = vst [vmem:[%s3921_s5 + $0x68] sm:$0xff] %v2216_v36  ;;  %v1735_v59 = vpop.f32.mrb[13].mxu0  ;;  %v1916_v29 = vmul.f32 %v2216_v36, %v2216_v36 }
 0x29c   : > { %1846 = vst [vmem:[%s3921_s5 + $0x60] sm:$0xff] %v1735_v59  ;;  %v1877_v10 = vadd.f32 %v1876_v11, %v1735_v59  ;;  %v1915_v50 = vmul.f32 %v1735_v59, %v1735_v59 }
 0x29e   : > { %v1946_v14 = vadd.f32 %v1945_v22, %v1915_v50  ;;  %v1878_v43 = vadd.f32 %v2216_v36, %v1877_v10 }
 0x2a0   : > { %v1947_v53 = vadd.f32 %v1946_v14, %v1916_v29 }
 0x2b2   : > { %v2219_v47 = vpop.f32.mrb[14].mxu0 }
 0x2b3   : > { %1849 = vst [vmem:[%s3921_s5 + $0x78] sm:$0xff] %v2219_v47  ;;  %v1745_v18 = vpop.f32.mrb[15].mxu0  ;;  %v1918_v9 = vmul.f32 %v2219_v47, %v2219_v47 }
 0x2b4   : > { %1848 = vst [vmem:[%s3921_s5 + $0x70] sm:$0xff] %v1745_v18  ;;  %v1879_v42 = vadd.f32 %v1878_v43, %v1745_v18  ;;  %v1917_v24 = vmul.f32 %v1745_v18, %v1745_v18 }
 0x2b6   : > { %v1880_v37 = vadd.f32 %v2219_v47, %v1879_v42  ;;  %v1948_v28 = vadd.f32 %v1947_v53, %v1917_v24 }
 0x2b8   : > { %v1949_v19 = vadd.f32 %v1948_v28, %v1918_v9 }
 0x2ca   : > { %v2222_v21 = vpop.f32.mrb[0].mxu1 }
 0x2cb   : > { %1851 = vst [vmem:[%s3921_s5 + $0x88] sm:$0xff] %v2222_v21  ;;  %v1755_v49 = vpop.f32.mrb[1].mxu1  ;;  %v1920_v7 = vmul.f32 %v2222_v21, %v2222_v21 }
 0x2cc   : > { %1850 = vst [vmem:[%s3921_s5 + $0x80] sm:$0xff] %v1755_v49  ;;  %v1881_v45 = vadd.f32 %v1880_v37, %v1755_v49  ;;  %v1919_v5 = vmul.f32 %v1755_v49, %v1755_v49 }
 0x2ce   : > { %v1950_v54 = vadd.f32 %v1949_v19, %v1919_v5  ;;  %v1882_v25 = vadd.f32 %v2222_v21, %v1881_v45 }
 0x2d0   : > { %v1951_v44 = vadd.f32 %v1950_v54, %v1920_v7 }
 0x2e2   : > { %v2225_v33 = vpop.f32.mrb[2].mxu1 }
 0x2e3   : > { %1853 = vst [vmem:[%s3921_s5 + $0x98] sm:$0xff] %v2225_v33  ;;  %v1765_v40 = vpop.f32.mrb[3].mxu1  ;;  %v1922_v62 = vmul.f32 %v2225_v33, %v2225_v33 }
 0x2e4   : > { %1852 = vst [vmem:[%s3921_s5 + $0x90] sm:$0xff] %v1765_v40  ;;  %v1883_v57 = vadd.f32 %v1882_v25, %v1765_v40  ;;  %v1921_v32 = vmul.f32 %v1765_v40, %v1765_v40 }
 0x2e6   : > { %v1952_v1 = vadd.f32 %v1951_v44, %v1921_v32  ;;  %v1884_v27 = vadd.f32 %v2225_v33, %v1883_v57 }
 0x2e8   : > { %v1953_v4 = vadd.f32 %v1952_v1, %v1922_v62 }
 0x2fa   : > { %v2228_v46 = vpop.f32.mrb[4].mxu1 }
 0x2fb   : > { %1855 = vst [vmem:[%s3921_s5 + $0xa8] sm:$0xff] %v2228_v46  ;;  %v1775_v39 = vpop.f32.mrb[5].mxu1  ;;  %v1924_v3 = vmul.f32 %v2228_v46, %v2228_v46 }
 0x2fc   : > { %1854 = vst [vmem:[%s3921_s5 + $0xa0] sm:$0xff] %v1775_v39  ;;  %v1885_v31 = vadd.f32 %v1884_v27, %v1775_v39  ;;  %v1923_v0 = vmul.f32 %v1775_v39, %v1775_v39 }
 0x2fe   : > { %v1954_v41 = vadd.f32 %v1953_v4, %v1923_v0  ;;  %v1886_v55 = vadd.f32 %v2228_v46, %v1885_v31 }
 0x300   : > { %v1955_v48 = vadd.f32 %v1954_v41, %v1924_v3 }
 0x312   : > { %v2231_v6 = vpop.f32.mrb[6].mxu1 }
 0x313   : > { %1857 = vst [vmem:[%s3921_s5 + $0xb8] sm:$0xff] %v2231_v6  ;;  %v1785_v20 = vpop.f32.mrb[7].mxu1  ;;  %v1926_v11 = vmul.f32 %v2231_v6, %v2231_v6 }
 0x314   : > { %1856 = vst [vmem:[%s3921_s5 + $0xb0] sm:$0xff] %v1785_v20  ;;  %v1887_v38 = vadd.f32 %v1886_v55, %v1785_v20  ;;  %v1925_v35 = vmul.f32 %v1785_v20, %v1785_v20 }
 0x316   : > { %v1956_v26 = vadd.f32 %v1955_v48, %v1925_v35  ;;  %v1888_v22 = vadd.f32 %v2231_v6, %v1887_v38 }
 0x318   : > { %v1957_v51 = vadd.f32 %v1956_v26, %v1926_v11 }
 0x32a   : > { %v2234_v8 = vpop.f32.mrb[8].mxu1 }
 0x32b   : > { %1859 = vst [vmem:[%s3921_s5 + $0xc8] sm:$0xff] %v2234_v8  ;;  %v1795_v2 = vpop.f32.mrb[9].mxu1  ;;  %v1928_v17 = vmul.f32 %v2234_v8, %v2234_v8 }
 0x32c   : > { %1858 = vst [vmem:[%s3921_s5 + $0xc0] sm:$0xff] %v1795_v2  ;;  %v1889_v58 = vadd.f32 %v1888_v22, %v1795_v2  ;;  %v1927_v16 = vmul.f32 %v1795_v2, %v1795_v2 }
 0x32e   : > { %v1958_v12 = vadd.f32 %v1957_v51, %v1927_v16  ;;  %v1890_v13 = vadd.f32 %v2234_v8, %v1889_v58 }
 0x330   : > { %v1959_v23 = vadd.f32 %v1958_v12, %v1928_v17 }
 0x342   : > { %v2237_v60 = vpop.f32.mrb[10].mxu1 }
 0x343   : > { %1861 = vst [vmem:[%s3921_s5 + $0xd8] sm:$0xff] %v2237_v60  ;;  %v1805_v63 = vpop.f32.mrb[11].mxu1  ;;  %v1930_v30 = vmul.f32 %v2237_v60, %v2237_v60 }
 0x344   : > { %1860 = vst [vmem:[%s3921_s5 + $0xd0] sm:$0xff] %v1805_v63  ;;  %v1891_v15 = vadd.f32 %v1890_v13, %v1805_v63  ;;  %v1929_v61 = vmul.f32 %v1805_v63, %v1805_v63 }
 0x346   : > { %v1960_v34 = vadd.f32 %v1959_v23, %v1929_v61  ;;  %v1892_v52 = vadd.f32 %v2237_v60, %v1891_v15 }
 0x348   : > { %v1961_v56 = vadd.f32 %v1960_v34, %v1930_v30 }
 0x35a   : > { %v2240_v36 = vpop.f32.mrb[12].mxu1 }
 0x35b   : > { %1863 = vst [vmem:[%s3921_s5 + $0xe8] sm:$0xff] %v2240_v36  ;;  %v1815_v59 = vpop.f32.mrb[13].mxu1  ;;  %v1932_v29 = vmul.f32 %v2240_v36, %v2240_v36 }
 0x35c   : > { %1862 = vst [vmem:[%s3921_s5 + $0xe0] sm:$0xff] %v1815_v59  ;;  %v1893_v10 = vadd.f32 %v1892_v52, %v1815_v59  ;;  %v1931_v50 = vmul.f32 %v1815_v59, %v1815_v59 }
 0x35e   : > { %v1962_v14 = vadd.f32 %v1961_v56, %v1931_v50  ;;  %v1894_v43 = vadd.f32 %v2240_v36, %v1893_v10 }
 0x360   : > { %v1963_v53 = vadd.f32 %v1962_v14, %v1932_v29 }
 0x367   : > { %v2243_v47 = vpop.f32.mrb[14].mxu1 }
 0x368   : > { %1865 = vst [vmem:[%s3921_s5 + $0xf8] sm:$0xff] %v2243_v47  ;;  %v1825_v18 = vpop.f32.mrb[15].mxu1 }
 0x369   : > { %1864 = vst [vmem:[%s3921_s5 + $0xf0] sm:$0xff] %v1825_v18  ;;  %v1895_v42 = vadd.f32 %v1894_v43, %v1825_v18  ;;  %v1933_v24 = vmul.f32 %v1825_v18, %v1825_v18 }
 0x36a   : > { %2343 = shalt.err (!%p2340_p3)
}
 0x36b   : > { %s2344_s25 = scalar_lea.hbm %s4050_s10, 4096  ;;  %s2348_s29 = scalar_lea.hbm %s4131_s2, 8192 }
 0x36c   : > { %p2345_p4 = scmp.ne.s32.totalorder %s4050_s10, %s2344_s25  ;;  %p2349_p9 = scmp.lt.u32.totalorder %s4050_s10, %s4131_s2 }
 0x36d   : > { %p2350_p10 = scmp.lt.u32.totalorder %s2348_s29, %s2344_s25  ;;  %p2352_p12 = scmp.lt.u32.totalorder %s2344_s25, %s4050_s10 }
 0x36e   : > { %p2346_p7 = pnand %p2345_p4, %p2495_p5 }
 0x36f   : > { %p2351_p11 = por %p2350_p10, %p2349_p9 }
 0x370   : > { %p2347_p8 = pneg %p2346_p7 }
 0x371   : > { %p2353_p13 = por %p2352_p12, %p2351_p11 }
 0x373   : > { %p2354_p0 = pnand %p2353_p13, %p2347_p8 }
 0x375   : > { %2357 = shalt.err (!%p2354_p0)
}
 0x376   : > { %s2435_s6 = smov 128   ;;  %v1934_v9 = vmul.f32 %v2243_v47, %v2243_v47  ;;  %v1896_v37 = vadd.f32 %v2243_v47, %v1895_v42  ;;  %v1964_v28 = vadd.f32 %v1963_v53, %v1933_v24  ;;  %s2106_s8 = sshll.u32 %s3901_s4, 1  ;;  %vm1972_vm12 = vcmask 1040384  }
 0x377   : > { %2259 = dma.vmem_to_hbm [thread:$0]  (%p2495_p5), %s4052_s7, 4096, %s4050_s10, %s1976_s11, %s2435_s6, %s2435_s6, %s2427_s30  }
 0x378   : > { %v1897_v19 = vrot.slane %v1896_v37, 4  ;;  %v1965_v21 = vadd.f32 %v1964_v28, %v1934_v9  ;;  %s2145_s9 = sshll.u32 %s2478_s16, 5  ;;  %s174_s30 = scalar_lea.vmem [#allocation4], %s2106_s8 }
 0x379   : > { %s2010_s7 = sshll.u32 %s174_s30, 4  ;;  %s4086_s17 = scalar_lea.hbm %s4132_s3, %s2145_s9  ;;  %s4088_s7 = int_to_ptr.vmem [resolvable:$true] %s2010_s7 }
 0x37a   : > { %v1898_v49 = vadd.f32 %v1897_v19, %v1896_v37  ;;  %v1966_v45 = vrot.slane %v1965_v21, 4  ;;  %s1981_s19 = scalar_lea.sflag [#allocation5], %s3901_s4  ;;  %s2358_s20 = scalar_lea.vmem %s4088_s7, 32 }
 0x37b   : > { %p2359_p1 = scmp.ne.s32.totalorder %s4088_s7, %s2358_s20  ;;  %s2436_s16 = smov [#allocation4]  }
 0x37c   : > { %v1899_v5 = vrot.slane %v1898_v49, 2  ;;  %v1967_v7 = vadd.f32 %v1966_v45, %v1965_v21  ;;  %s2362_s24 = sshll.u32 %s2436_s16, 4  ;;  %s2363_s24 = int_to_ptr.vmem [resolvable:$false] %s2362_s24 }
 0x37d   : > { %p2360_p2 = pnand %p2359_p1, %p2495_p5  ;;  %s2364_s25 = scalar_lea.vmem %s2363_s24, 64 }
 0x37e   : > { %v1900_v54 = vadd.f32 %v1899_v5, %v1898_v49  ;;  %v1968_v25 = vrot.slane %v1967_v7, 2  ;;  %p2365_p4 = scmp.lt.s32.totalorder %s4088_s7, %s2363_s24  ;;  %p2366_p7 = scmp.lt.s32.totalorder %s2364_s25, %s2358_s20 }
 0x37f   : > { %p2361_p3 = pneg %p2360_p2 }
 0x380   : > { %v1901_v44 = vrot.slane %v1900_v54, 1  ;;  %v1969_v33 = vadd.f32 %v1968_v25, %v1967_v7  ;;  %p2367_p8 = por %p2366_p7, %p2365_p4 }
 0x382   : > { %v1970_v40 = vrot.slane %v1969_v33, 1  ;;  %v1902_v57 = vadd.f32 %v1901_v44, %v1900_v54  ;;  %p2368_p9 = pnand %p2367_p8, %p2361_p3 }
 0x384   : > { %v1971_v32 = vadd.f32 %v1970_v40, %v1969_v33 }
 0x386   : > { %v1973_v62 = vsel %vm1972_vm12, %v1902_v57, %v1971_v32 }
 0x387   : > { %1974 = vst [vmem:[%s174_s30] sm:$0x3] %v1973_v62 }
 0x388   : > { %2371 = shalt.err (!%p2368_p9)
}
 0x389   : > { %s2372_s4 = scalar_lea.hbm %s4086_s17, 32  ;;  %s2376_s29 = scalar_lea.hbm %s4132_s3, 64 }
 0x38a   : > { %p2373_p10 = scmp.ne.s32.totalorder %s4086_s17, %s2372_s4  ;;  %p2377_p13 = scmp.lt.u32.totalorder %s4086_s17, %s4132_s3 }
 0x38b   : > { %p2378_p0 = scmp.lt.u32.totalorder %s2376_s29, %s2372_s4  ;;  %p2380_p2 = scmp.lt.u32.totalorder %s2372_s4, %s4086_s17 }
 0x38c   : > { %p2374_p11 = pnand %p2373_p10, %p2495_p5 }
 0x38d   : > { %p2379_p1 = por %p2378_p0, %p2377_p13 }
 0x38e   : > { %p2375_p12 = pneg %p2374_p11 }
 0x38f   : > { %p2381_p3 = por %p2380_p2, %p2379_p1 }
 0x391   : > { %p2382_p4 = pnand %p2381_p3, %p2375_p12 }
 0x393   : > { %2385 = shalt.err (!%p2382_p4)
}
 0x394   : > { %2260 = dma.vmem_to_hbm [thread:$0]  (%p2495_p5), %s4088_s7, 32, %s4086_s17, %s1981_s19  }
 0x395 PF: > { %p2270_p7 = scmp.ge.s32.totalorder %s2424_s15, 2  ;;  %s2022_s6 = sand.u32 1, %s2412_s12  }
 0x396   : > { %s2023_s8 = scalar_lea.sflag [#allocation3], %s2022_s6 }
 0x397   : > { %p2264_p8 = pnand %p2270_p7, %p2499_p6 }
 0x399   : > { %2403 = dma.done.wait (!%p2264_p8), %s2023_s8, 4096  }
 0x39a   : > { %2405 = vsyncadd (!%p2264_p8), %s2023_s8, 4294963200  ;;  %s2032_s9 = scalar_lea.sflag [#allocation5], %s2022_s6 }
 0x39b   : > { %2407 = dma.done.wait (!%p2264_p8), %s2032_s9, 32  }
 0x39c   : > { %2409 = vsyncadd (!%p2264_p8), %s2032_s9, 4294967264  ;;  %p17_p5 = scmp.ge.s32.totalorder %s2482_s18, 4   ;;  %s4346_s12 = smov %s2416_s13 }
 0x39d   : > { %s4347_s13 = smov %s2420_s14  ;;  %s4348_s14 = smov %s2493_s21 }
 0x39e   : > { %s4349_s15 = smov %s2482_s18  ;;  %19 = sbr.rel (!%p17_p5) target bundleno = 5 (0x5), region = 80 }
 0x3a5   :  { %2037 = vsyncpa [#allocation3], 1 }
 0x3a6   :  { %2039 = vsyncpa [#allocation3 + $0x1], 1 }
 0x3a7   :  { %2040 = vsyncpa [#allocation5], 1 }
 0x3a8   :  { %2042 = vsyncpa [#allocation5 + $0x1], 1 }

</bundles_post_ra>
